<compile_context>
chip_gen: v7x
topology: tpu7x:2x2x1
jax: 0.10.0
libtpu: 0.0.40
codegen_flags: <defaults>
</compile_context>

<pallas_src>
import functools

import jax
import jax.numpy as jnp
from jax import lax
from jax.experimental import pallas as pl
from jax.experimental.pallas import tpu as pltpu

KSIZE = 7
PAD = 3
SC = 8  # f32 sublane chunk for the running sum/max accumulators


def _round_up(x, m):
    return ((x + m - 1) // m) * m


def _spatial_attn_kernel(x_ref, w_ref, b_ref, o_ref,
                         padf_ref, sum_ref, max_ref,
                         *, C, C_blk, W, HW, BB, OFF, L2):
    """One grid step at (batch block i, channel block k).

    x_ref   : (BB, C_blk, HW)  native dtype, lane-dense (HW on lanes)
    w_ref   : (98,)            SMEM, flattened conv weight [c_in, kh, kw]
    b_ref   : (1,)             SMEM, conv bias
    o_ref   : (1, BB, HW)      output block (batch on sublanes, lane-dense)
    padf_ref: (2, BB, L2)      f32 scratch: zero-padded flat [avg, max] maps
    sum_ref : (BB, SC, HW)     f32 running channel sum (element-wise acc)
    max_ref : (BB, SC, HW)     f32 running channel max (element-wise acc)
    """
    k = pl.program_id(1)
    n_k = pl.num_programs(1)

    # ---- init running accumulators on the first channel block ----
    @pl.when(k == 0)
    def _init():
        sum_ref[...] = jnp.zeros_like(sum_ref)
        max_ref[...] = jnp.full_like(max_ref, -jnp.inf)

    # ---- fused, batch-vectorized, element-wise accumulation (VALU only) ----
    n_full = C_blk // SC
    rem = C_blk - n_full * SC

    def _accum_full(j0):
        chunk = x_ref[:, pl.ds(j0, SC), :].astype(jnp.float32)   # (BB, SC, HW)
        sum_ref[...] = sum_ref[...] + chunk
        max_ref[...] = jnp.maximum(max_ref[...], chunk)

    if 0 < n_full <= 16:
        for t in range(n_full):
            _accum_full(t * SC)
    elif n_full > 16:
        def _body(t, carry):
            _accum_full(pl.multiple_of(t * SC, SC))
            return carry
        lax.fori_loop(0, n_full, _body, 0, unroll=4)

    if rem:
        chunk = x_ref[:, pl.ds(n_full * SC, rem), :].astype(jnp.float32)
        cur_s = sum_ref[:, pl.ds(0, rem), :]
        sum_ref[:, pl.ds(0, rem), :] = cur_s + chunk
        cur_m = max_ref[:, pl.ds(0, rem), :]
        max_ref[:, pl.ds(0, rem), :] = jnp.maximum(cur_m, chunk)

    # ---- last channel block: 7x7 conv(2->1) + sigmoid, batch on sublanes ----
    @pl.when(k == n_k - 1)
    def _finalize():
        inv_c = jnp.float32(1.0 / C)
        # One sublane reduce per batch block (the only XLU work in the kernel).
        avg = jnp.sum(sum_ref[...], axis=1) * inv_c          # (BB, HW)
        mx = jnp.max(max_ref[...], axis=1)                   # (BB, HW)

        # Zero only the halo strips (conv row padding); the interior
        # [OFF, OFF + HW) is fully overwritten below.
        tail = L2 - OFF - HW
        padf_ref[:, :, pl.ds(0, OFF)] = jnp.zeros((2, BB, OFF), jnp.float32)
        padf_ref[:, :, pl.ds(OFF + HW, tail)] = jnp.zeros(
            (2, BB, tail), jnp.float32)
        padf_ref[0, :, pl.ds(OFF, HW)] = avg
        padf_ref[1, :, pl.ds(OFF, HW)] = mx

        # Column (left/right padding) validity built from one lane iota.
        col = lax.broadcasted_iota(jnp.int32, (BB, HW), 1) % W

        acc = jnp.full((BB, HW), b_ref[0], dtype=jnp.float32)
        for dx in range(KSIZE):
            ox = dx - PAD
            valid = jnp.logical_and(col >= -ox, col < W - ox)
            inner = jnp.zeros((BB, HW), jnp.float32)
            for c in range(2):
                for dy in range(KSIZE):
                    # Each tap: one contiguous (BB, HW) shifted load serving
                    # the whole batch block (row padding from the zero halos,
                    # column padding from `valid`).
                    start = OFF + (dy - PAD) * W + ox
                    tap = padf_ref[c, :, pl.ds(start, HW)]        # (BB, HW)
                    w = w_ref[c * KSIZE * KSIZE + dy * KSIZE + dx]
                    inner = inner + w * tap
            acc = acc + jnp.where(valid, inner, jnp.float32(0.0))

        # Dense, lane-full (BB, HW) writeback.
        o_ref[0] = jax.nn.sigmoid(acc).astype(o_ref.dtype)


def _tpu_vmem_and_cores():
    """Best-effort (VMEM capacity, TensorCores-per-chip) query."""
    vmem_cap = 128 * 1024 * 1024
    try:
        info = pltpu.get_tpu_info()
        cap = getattr(info, "vmem_capacity_bytes", None)
        if cap:
            vmem_cap = int(cap)
    except Exception:
        pass
    kind = ""
    try:
        kind = jax.devices()[0].device_kind.lower()
    except Exception:
        pass
    # v7x: 64 MiB VMEM per TensorCore, 2 TensorCores per chip.
    n_tc = 2 if ("v7" in kind or vmem_cap <= 64 * 1024 * 1024) else 1
    return vmem_cap, n_tc


def _pick_batch_block(B, n_tc, max_bb=32):
    divisors = [d for d in range(1, B + 1) if B % d == 0 and d <= max_bb]
    if not divisors:
        return 1
    if n_tc >= 2:
        # Keep an even number (>= 2) of parallel batch steps so both
        # TensorCores get balanced work.
        even = [d for d in divisors if (B // d) >= 2 and (B // d) % 2 == 0]
        if even:
            return max(even)
        ge2 = [d for d in divisors if (B // d) >= 2]
        if ge2:
            return max(ge2)
    # Single TensorCore: largest block = fewest grid steps.
    return max(divisors)


def _pick_channel_block(C, BB, HW, itemsize, budget_bytes):
    """Largest pack-aligned divisor of C whose double-buffered window fits."""
    pack = max(8, 32 // itemsize)            # 8 (f32), 16 (bf16), 32 (int8)

    def window(cb):
        return 2 * BB * cb * HW * itemsize   # double-buffered input block

    if window(C) <= budget_bytes:
        return C
    best = None
    for cb in range(pack, C, pack):
        if C % cb == 0 and window(cb) <= budget_bytes:
            best = cb
    # TODO(synk): ragged channel blocks (no pack-aligned divisor under budget)
    # would need in-kernel row masking; fall back to a single full-C block.
    return best if best is not None else C


def spatial_attention_pallas(x, weight, bias):
    """x: (B, C, H, W); weight: (1, 2, 7, 7); bias: (1,). Returns (B, 1, H, W)."""
    B, C, H, W = x.shape
    HW = H * W
    itemsize = jnp.dtype(x.dtype).itemsize

    # Lane-dense views: HW is the minor (128-lane) axis everywhere.
    x_flat = x.reshape(B, C, HW)                       # no wrapper-side cast
    w_flat = weight.astype(jnp.float32).reshape(-1)    # (98,)  [c_in, kh, kw]
    b_flat = bias.astype(jnp.float32).reshape(-1)      # (1,)

    vmem_cap, n_tc = _tpu_vmem_and_cores()
    # Generation-aware streamed-window budget (double-buffered input block).
    if vmem_cap >= 100 * 1024 * 1024:          # v5e / v6e: 128 MiB physical
        window_budget = 40 * 1024 * 1024
    else:                                      # v7x: 64 MiB physical per core
        window_budget = 22 * 1024 * 1024

    BB = _pick_batch_block(B, n_tc)
    C_blk = _pick_channel_block(C, BB, HW, itemsize, window_budget)
    n_cblk = C // C_blk

    # Flat zero-padded conv scratch: each (H, W) map is embedded row-major at
    # the lane-aligned offset OFF; the 3 zero rows above/below live in
    # [0, OFF) and [OFF + HW, L2).
    OFF = _round_up(3 * W + 3, 128)
    L2 = _round_up(OFF + HW + 3 * W + 3, 128)

    kernel = functools.partial(
        _spatial_attn_kernel,
        C=C, C_blk=C_blk, W=W, HW=HW, BB=BB, OFF=OFF, L2=L2)

    # VMEM limit: 2x double-buffered input block + 2x output block + scratch
    # + headroom, clamped below the generation's physical capacity.
    in_bytes = BB * C_blk * HW * itemsize
    out_bytes = BB * HW * itemsize
    scratch_bytes = 4 * (2 * BB * L2 + 2 * BB * SC * HW)
    needed = 2 * in_bytes + 2 * out_bytes + scratch_bytes + 2 * 1024 * 1024
    cap = max(16 * 1024 * 1024,
              min(vmem_cap - 16 * 1024 * 1024, 96 * 1024 * 1024))
    vmem_limit = int(min(max(needed, 16 * 1024 * 1024), cap))

    out_blocked = pl.pallas_call(
        kernel,
        out_shape=jax.ShapeDtypeStruct((B // BB, BB, HW), x.dtype),
        grid_spec=pltpu.PrefetchScalarGridSpec(
            num_scalar_prefetch=0,
            grid=(B // BB, n_cblk),
            in_specs=[
                pl.BlockSpec((BB, C_blk, HW), lambda i, k: (i, k, 0)),
                pl.BlockSpec(memory_space=pltpu.MemorySpace.SMEM),
                pl.BlockSpec(memory_space=pltpu.MemorySpace.SMEM),
            ],
            out_specs=pl.BlockSpec((1, BB, HW), lambda i, k: (i, 0, 0)),
            scratch_shapes=[
                pltpu.VMEM((2, BB, L2), jnp.float32),    # padded avg/max maps
                pltpu.VMEM((BB, SC, HW), jnp.float32),   # running channel sum
                pltpu.VMEM((BB, SC, HW), jnp.float32),   # running channel max
            ],
        ),
        compiler_params=pltpu.CompilerParams(
            dimension_semantics=("parallel", "arbitrary"),
            vmem_limit_bytes=vmem_limit),
    )(x_flat, w_flat, b_flat)

    return out_blocked.reshape(B, 1, H, W)


def spatial_attention_ref(x, weight, bias):
    """Pure-JAX reference matching the PyTorch forward."""
    avg_out = jnp.mean(x, axis=1, keepdims=True)
    max_out = jnp.max(x, axis=1, keepdims=True)
    feat = jnp.concatenate([avg_out, max_out], axis=1)        # (B, 2, H, W)
    y = lax.conv_general_dilated(
        feat, weight, window_strides=(1, 1),
        padding=((PAD, PAD), (PAD, PAD)),
        dimension_numbers=("NCHW", "OIHW", "NCHW"))
    y = y + bias.reshape(1, -1, 1, 1)
    return jax.nn.sigmoid(y)


if __name__ == "__main__":
    key = jax.random.PRNGKey(0)
    kx, kw, kb = jax.random.split(key, 3)

    B, C, H, W = 2, 4, 16, 16
    x = jax.random.normal(kx, (B, C, H, W), dtype=jnp.float32)

    # Deterministic synthetic parameters for Conv2d(2, 1, kernel_size=7, padding=3)
    weight = 0.1 * jax.random.normal(kw, (1, 2, KSIZE, KSIZE), dtype=jnp.float32)
    bias = 0.05 * jax.random.normal(kb, (1,), dtype=jnp.float32)

    out = spatial_attention_pallas(x, weight, bias)
    out = jax.block_until_ready(out)

    ref = spatial_attention_ref(x, weight, bias)
    assert out.shape == (B, 1, H, W), out.shape
    assert jnp.allclose(out, ref, atol=1e-5, rtol=1e-5), float(
        jnp.max(jnp.abs(out - ref)))

    print("KERNEL_OK")
</pallas_src>

<mosaic_0001>
module attributes {stable_mosaic.version = 11 : i64} {
  func.func @_spatial_attn_kernel(%arg0: i32, %arg1: i32, %arg2: memref<2x4x256xf32, #tpu.memory_space<vmem>>, %arg3: memref<98xf32, #tpu.memory_space<smem>>, %arg4: memref<1xf32, #tpu.memory_space<smem>>, %arg5: memref<1x2x256xf32, #tpu.memory_space<vmem>>, %arg6: memref<2x2x512xf32, #tpu.memory_space<vmem>>, %arg7: memref<2x8x256xf32, #tpu.memory_space<vmem>>, %arg8: memref<2x8x256xf32, #tpu.memory_space<vmem>>) attributes {dimension_semantics = [#tpu.dimension_semantics<parallel>, #tpu.dimension_semantics<arbitrary>], iteration_bounds = array<i64: 1, 1>, scalar_prefetch = 0 : i64, scratch_operands = 3 : i64, tpu.core_type = #tpu.core_type<tc>, window_params = [{transform_indices = @transform_0, window_bounds = array<i64: 2, 4, 256>}, {transform_indices = @transform_1, window_bounds = array<i64: 98>}, {transform_indices = @transform_2, window_bounds = array<i64: 1>}, {transform_indices = @transform_3, window_bounds = array<i64: 1, 2, 256>}]} {
    %c0_i32 = arith.constant 0 : i32
    %0 = arith.cmpi eq, %arg1, %c0_i32 : i32
    %1 = arith.extui %0 : i1 to i32
    %c0_i32_0 = arith.constant 0 : i32
    %2 = arith.cmpi ne, %1, %c0_i32_0 : i32
    scf.if %2 {
      %cst = arith.constant 0.000000e+00 : f32
      %13 = vector.broadcast %cst : f32 to vector<2x8x256xf32>
      %c0_17 = arith.constant 0 : index
      %c0_18 = arith.constant 0 : index
      %c0_19 = arith.constant 0 : index
      %14 = vector.load %arg7[%c0_17, %c0_18, %c0_19] : memref<2x8x256xf32, #tpu.memory_space<vmem>>, vector<2x8x256xf32>
      tpu.vector_store %arg7[%c0_17, %c0_18, %c0_19], %13 {strides = array<i32>} : memref<2x8x256xf32, #tpu.memory_space<vmem>>, vector<2x8x256xf32>,
      %cst_20 = arith.constant 0xFF800000 : f32
      %15 = vector.broadcast %cst_20 : f32 to vector<2x8x256xf32>
      %c0_21 = arith.constant 0 : index
      %c0_22 = arith.constant 0 : index
      %c0_23 = arith.constant 0 : index
      %16 = vector.load %arg8[%c0_21, %c0_22, %c0_23] : memref<2x8x256xf32, #tpu.memory_space<vmem>>, vector<2x8x256xf32>
      tpu.vector_store %arg8[%c0_21, %c0_22, %c0_23], %15 {strides = array<i32>} : memref<2x8x256xf32, #tpu.memory_space<vmem>>, vector<2x8x256xf32>,
    } else {
    }
    %c0 = arith.constant 0 : index
    %c0_1 = arith.constant 0 : index
    %c0_2 = arith.constant 0 : index
    %3 = vector.load %arg2[%c0, %c0_1, %c0_2] : memref<2x4x256xf32, #tpu.memory_space<vmem>>, vector<2x4x256xf32>
    %c0_3 = arith.constant 0 : index
    %c0_4 = arith.constant 0 : index
    %c0_5 = arith.constant 0 : index
    %4 = vector.load %arg7[%c0_3, %c0_4, %c0_5] : memref<2x8x256xf32, #tpu.memory_space<vmem>>, vector<2x4x256xf32>
    %5 = arith.addf %4, %3 : vector<2x4x256xf32>
    %c0_6 = arith.constant 0 : index
    %c0_7 = arith.constant 0 : index
    %c0_8 = arith.constant 0 : index
    %6 = vector.load %arg7[%c0_6, %c0_7, %c0_8] : memref<2x8x256xf32, #tpu.memory_space<vmem>>, vector<2x4x256xf32>
    tpu.vector_store %arg7[%c0_6, %c0_7, %c0_8], %5 {strides = array<i32>} : memref<2x8x256xf32, #tpu.memory_space<vmem>>, vector<2x4x256xf32>,
    %c0_9 = arith.constant 0 : index
    %c0_10 = arith.constant 0 : index
    %c0_11 = arith.constant 0 : index
    %7 = vector.load %arg8[%c0_9, %c0_10, %c0_11] : memref<2x8x256xf32, #tpu.memory_space<vmem>>, vector<2x4x256xf32>
    %8 = arith.maximumf %7, %3 : vector<2x4x256xf32>
    %c0_12 = arith.constant 0 : index
    %c0_13 = arith.constant 0 : index
    %c0_14 = arith.constant 0 : index
    %9 = vector.load %arg8[%c0_12, %c0_13, %c0_14] : memref<2x8x256xf32, #tpu.memory_space<vmem>>, vector<2x4x256xf32>
    tpu.vector_store %arg8[%c0_12, %c0_13, %c0_14], %8 {strides = array<i32>} : memref<2x8x256xf32, #tpu.memory_space<vmem>>, vector<2x4x256xf32>,
    %c0_i32_15 = arith.constant 0 : i32
    %10 = arith.cmpi eq, %arg1, %c0_i32_15 : i32
    %11 = arith.extui %10 : i1 to i32
    %c0_i32_16 = arith.constant 0 : i32
    %12 = arith.cmpi ne, %11, %c0_i32_16 : i32
    scf.if %12 {
      %c0_17 = arith.constant 0 : index
      %c0_18 = arith.constant 0 : index
      %c0_19 = arith.constant 0 : index
      %13 = vector.load %arg7[%c0_17, %c0_18, %c0_19] : memref<2x8x256xf32, #tpu.memory_space<vmem>>, vector<2x8x256xf32>
      %cst = arith.constant dense<0.000000e+00> : vector<2x256xf32>
      %14 = vector.multi_reduction <add>, %13, %cst [1] : vector<2x8x256xf32> to vector<2x256xf32>
      %cst_20 = arith.constant 2.500000e-01 : f32
      %15 = vector.broadcast %cst_20 : f32 to vector<2x256xf32>
      %16 = arith.mulf %14, %15 : vector<2x256xf32>
      %c0_21 = arith.constant 0 : index
      %c0_22 = arith.constant 0 : index
      %c0_23 = arith.constant 0 : index
      %17 = vector.load %arg8[%c0_21, %c0_22, %c0_23] : memref<2x8x256xf32, #tpu.memory_space<vmem>>, vector<2x8x256xf32>
      %cst_24 = arith.constant dense<0xFF800000> : vector<2x256xf32>
      %18 = vector.multi_reduction <maximumf>, %17, %cst_24 [1] : vector<2x8x256xf32> to vector<2x256xf32>
      %cst_25 = arith.constant 0.000000e+00 : f32
      %19 = vector.broadcast %cst_25 : f32 to vector<2x2x128xf32>
      %c0_26 = arith.constant 0 : index
      %c0_27 = arith.constant 0 : index
      %c0_28 = arith.constant 0 : index
      %20 = vector.load %arg6[%c0_26, %c0_27, %c0_28] : memref<2x2x512xf32, #tpu.memory_space<vmem>>, vector<2x2x128xf32>
      tpu.vector_store %arg6[%c0_26, %c0_27, %c0_28], %19 {strides = array<i32>} : memref<2x2x512xf32, #tpu.memory_space<vmem>>, vector<2x2x128xf32>,
      %cst_29 = arith.constant 0.000000e+00 : f32
      %21 = vector.broadcast %cst_29 : f32 to vector<2x2x128xf32>
      %c0_30 = arith.constant 0 : index
      %c0_31 = arith.constant 0 : index
      %c384 = arith.constant 384 : index
      %22 = vector.load %arg6[%c0_30, %c0_31, %c384] : memref<2x2x512xf32, #tpu.memory_space<vmem>>, vector<2x2x128xf32>
      tpu.vector_store %arg6[%c0_30, %c0_31, %c384], %21 {strides = array<i32>} : memref<2x2x512xf32, #tpu.memory_space<vmem>>, vector<2x2x128xf32>,
      %c0_32 = arith.constant 0 : index
      %c0_33 = arith.constant 0 : index
      %c128 = arith.constant 128 : index
      %23 = vector.load %arg6[%c0_32, %c0_33, %c128] : memref<2x2x512xf32, #tpu.memory_space<vmem>>, vector<1x2x256xf32>
      %24 = vector.shape_cast %23 : vector<1x2x256xf32> to vector<2x256xf32>
      %25 = vector.shape_cast %16 : vector<2x256xf32> to vector<1x2x256xf32>
      tpu.vector_store %arg6[%c0_32, %c0_33, %c128], %25 {strides = array<i32>} : memref<2x2x512xf32, #tpu.memory_space<vmem>>, vector<1x2x256xf32>,
      %c1 = arith.constant 1 : index
      %c0_34 = arith.constant 0 : index
      %c128_35 = arith.constant 128 : index
      %26 = vector.load %arg6[%c1, %c0_34, %c128_35] : memref<2x2x512xf32, #tpu.memory_space<vmem>>, vector<1x2x256xf32>
      %27 = vector.shape_cast %26 : vector<1x2x256xf32> to vector<2x256xf32>
      %28 = vector.shape_cast %18 : vector<2x256xf32> to vector<1x2x256xf32>
      tpu.vector_store %arg6[%c1, %c0_34, %c128_35], %28 {strides = array<i32>} : memref<2x2x512xf32, #tpu.memory_space<vmem>>, vector<1x2x256xf32>,
      %29 = tpu.iota {dimensions = array<i32: 1>} : vector<2x256xi32>
      %c16_i32 = arith.constant 16 : i32
      %c0_i32_36 = arith.constant 0 : i32
      %30 = arith.cmpi eq, %c16_i32, %c0_i32_36 : i32
      %c1_i32 = arith.constant 1 : i32
      %31 = arith.select %30, %c1_i32, %c16_i32 : i32
      %32 = vector.broadcast %31 : i32 to vector<2x256xi32>
      %33 = arith.remsi %29, %32 : vector<2x256xi32>
      %c0_i32_37 = arith.constant 0 : i32
      %34 = vector.broadcast %c0_i32_37 : i32 to vector<2x256xi32>
      %35 = arith.cmpi ne, %33, %34 : vector<2x256xi32>
      %c0_i32_38 = arith.constant 0 : i32
      %36 = vector.broadcast %c0_i32_38 : i32 to vector<2x256xi32>
      %37 = arith.cmpi slt, %33, %36 : vector<2x256xi32>
      %c0_i32_39 = arith.constant 0 : i32
      %38 = arith.cmpi slt, %31, %c0_i32_39 : i32
      %39 = vector.broadcast %38 : i1 to vector<2x256xi1>
      %40 = vector.broadcast %39 : vector<2x256xi1> to vector<2x256xi1>
      %41 = arith.xori %37, %40 : vector<2x256xi1>
      %42 = arith.andi %41, %35 : vector<2x256xi1>
      %43 = vector.broadcast %31 : i32 to vector<2x256xi32>
      %44 = arith.addi %33, %43 : vector<2x256xi32>
      %45 = arith.select %42, %44, %33 : vector<2x256xi1>, vector<2x256xi32>
      %c0_40 = arith.constant 0 : index
      %46 = memref.load %arg4[%c0_40] : memref<1xf32, #tpu.memory_space<smem>>
      %47 = vector.broadcast %46 : f32 to vector<2x256xf32>
      %c3_i32 = arith.constant 3 : i32
      %48 = vector.broadcast %c3_i32 : i32 to vector<2x256xi32>
      %49 = arith.cmpi sge, %45, %48 : vector<2x256xi32>
      %c19_i32 = arith.constant 19 : i32
      %50 = vector.broadcast %c19_i32 : i32 to vector<2x256xi32>
      %51 = arith.cmpi slt, %45, %50 : vector<2x256xi32>
      %52 = arith.andi %49, %51 : vector<2x256xi1>
      %cst_41 = arith.constant 0.000000e+00 : f32
      %53 = vector.broadcast %cst_41 : f32 to vector<2x256xf32>
      %c0_42 = arith.constant 0 : index
      %c0_43 = arith.constant 0 : index
      %c77 = arith.constant 77 : index
      %54 = vector.load %arg6[%c0_42, %c0_43, %c77] : memref<2x2x512xf32, #tpu.memory_space<vmem>>, vector<1x2x256xf32>
      %55 = vector.shape_cast %54 : vector<1x2x256xf32> to vector<2x256xf32>
      %c0_44 = arith.constant 0 : index
      %56 = memref.load %arg3[%c0_44] : memref<98xf32, #tpu.memory_space<smem>>
      %57 = vector.broadcast %56 : f32 to vector<2x256xf32>
      %58 = arith.mulf %57, %55 : vector<2x256xf32>
      %59 = arith.addf %53, %58 : vector<2x256xf32>
      %c0_45 = arith.constant 0 : index
      %c0_46 = arith.constant 0 : index
      %c93 = arith.constant 93 : index
      %60 = vector.load %arg6[%c0_45, %c0_46, %c93] : memref<2x2x512xf32, #tpu.memory_space<vmem>>, vector<1x2x256xf32>
      %61 = vector.shape_cast %60 : vector<1x2x256xf32> to vector<2x256xf32>
      %c7 = arith.constant 7 : index
      %62 = memref.load %arg3[%c7] : memref<98xf32, #tpu.memory_space<smem>>
      %63 = vector.broadcast %62 : f32 to vector<2x256xf32>
      %64 = arith.mulf %63, %61 : vector<2x256xf32>
      %65 = arith.addf %59, %64 : vector<2x256xf32>
      %c0_47 = arith.constant 0 : index
      %c0_48 = arith.constant 0 : index
      %c109 = arith.constant 109 : index
      %66 = vector.load %arg6[%c0_47, %c0_48, %c109] : memref<2x2x512xf32, #tpu.memory_space<vmem>>, vector<1x2x256xf32>
      %67 = vector.shape_cast %66 : vector<1x2x256xf32> to vector<2x256xf32>
      %c14 = arith.constant 14 : index
      %68 = memref.load %arg3[%c14] : memref<98xf32, #tpu.memory_space<smem>>
      %69 = vector.broadcast %68 : f32 to vector<2x256xf32>
      %70 = arith.mulf %69, %67 : vector<2x256xf32>
      %71 = arith.addf %65, %70 : vector<2x256xf32>
      %c0_49 = arith.constant 0 : index
      %c0_50 = arith.constant 0 : index
      %c125 = arith.constant 125 : index
      %72 = vector.load %arg6[%c0_49, %c0_50, %c125] : memref<2x2x512xf32, #tpu.memory_space<vmem>>, vector<1x2x256xf32>
      %73 = vector.shape_cast %72 : vector<1x2x256xf32> to vector<2x256xf32>
      %c21 = arith.constant 21 : index
      %74 = memref.load %arg3[%c21] : memref<98xf32, #tpu.memory_space<smem>>
      %75 = vector.broadcast %74 : f32 to vector<2x256xf32>
      %76 = arith.mulf %75, %73 : vector<2x256xf32>
      %77 = arith.addf %71, %76 : vector<2x256xf32>
      %c0_51 = arith.constant 0 : index
      %c0_52 = arith.constant 0 : index
      %c141 = arith.constant 141 : index
      %78 = vector.load %arg6[%c0_51, %c0_52, %c141] : memref<2x2x512xf32, #tpu.memory_space<vmem>>, vector<1x2x256xf32>
      %79 = vector.shape_cast %78 : vector<1x2x256xf32> to vector<2x256xf32>
      %c28 = arith.constant 28 : index
      %80 = memref.load %arg3[%c28] : memref<98xf32, #tpu.memory_space<smem>>
      %81 = vector.broadcast %80 : f32 to vector<2x256xf32>
      %82 = arith.mulf %81, %79 : vector<2x256xf32>
      %83 = arith.addf %77, %82 : vector<2x256xf32>
      %c0_53 = arith.constant 0 : index
      %c0_54 = arith.constant 0 : index
      %c157 = arith.constant 157 : index
      %84 = vector.load %arg6[%c0_53, %c0_54, %c157] : memref<2x2x512xf32, #tpu.memory_space<vmem>>, vector<1x2x256xf32>
      %85 = vector.shape_cast %84 : vector<1x2x256xf32> to vector<2x256xf32>
      %c35 = arith.constant 35 : index
      %86 = memref.load %arg3[%c35] : memref<98xf32, #tpu.memory_space<smem>>
      %87 = vector.broadcast %86 : f32 to vector<2x256xf32>
      %88 = arith.mulf %87, %85 : vector<2x256xf32>
      %89 = arith.addf %83, %88 : vector<2x256xf32>
      %c0_55 = arith.constant 0 : index
      %c0_56 = arith.constant 0 : index
      %c173 = arith.constant 173 : index
      %90 = vector.load %arg6[%c0_55, %c0_56, %c173] : memref<2x2x512xf32, #tpu.memory_space<vmem>>, vector<1x2x256xf32>
      %91 = vector.shape_cast %90 : vector<1x2x256xf32> to vector<2x256xf32>
      %c42 = arith.constant 42 : index
      %92 = memref.load %arg3[%c42] : memref<98xf32, #tpu.memory_space<smem>>
      %93 = vector.broadcast %92 : f32 to vector<2x256xf32>
      %94 = arith.mulf %93, %91 : vector<2x256xf32>
      %95 = arith.addf %89, %94 : vector<2x256xf32>
      %c1_57 = arith.constant 1 : index
      %c0_58 = arith.constant 0 : index
      %c77_59 = arith.constant 77 : index
      %96 = vector.load %arg6[%c1_57, %c0_58, %c77_59] : memref<2x2x512xf32, #tpu.memory_space<vmem>>, vector<1x2x256xf32>
      %97 = vector.shape_cast %96 : vector<1x2x256xf32> to vector<2x256xf32>
      %c49 = arith.constant 49 : index
      %98 = memref.load %arg3[%c49] : memref<98xf32, #tpu.memory_space<smem>>
      %99 = vector.broadcast %98 : f32 to vector<2x256xf32>
      %100 = arith.mulf %99, %97 : vector<2x256xf32>
      %101 = arith.addf %95, %100 : vector<2x256xf32>
      %c1_60 = arith.constant 1 : index
      %c0_61 = arith.constant 0 : index
      %c93_62 = arith.constant 93 : index
      %102 = vector.load %arg6[%c1_60, %c0_61, %c93_62] : memref<2x2x512xf32, #tpu.memory_space<vmem>>, vector<1x2x256xf32>
      %103 = vector.shape_cast %102 : vector<1x2x256xf32> to vector<2x256xf32>
      %c56 = arith.constant 56 : index
      %104 = memref.load %arg3[%c56] : memref<98xf32, #tpu.memory_space<smem>>
      %105 = vector.broadcast %104 : f32 to vector<2x256xf32>
      %106 = arith.mulf %105, %103 : vector<2x256xf32>
      %107 = arith.addf %101, %106 : vector<2x256xf32>
      %c1_63 = arith.constant 1 : index
      %c0_64 = arith.constant 0 : index
      %c109_65 = arith.constant 109 : index
      %108 = vector.load %arg6[%c1_63, %c0_64, %c109_65] : memref<2x2x512xf32, #tpu.memory_space<vmem>>, vector<1x2x256xf32>
      %109 = vector.shape_cast %108 : vector<1x2x256xf32> to vector<2x256xf32>
      %c63 = arith.constant 63 : index
      %110 = memref.load %arg3[%c63] : memref<98xf32, #tpu.memory_space<smem>>
      %111 = vector.broadcast %110 : f32 to vector<2x256xf32>
      %112 = arith.mulf %111, %109 : vector<2x256xf32>
      %113 = arith.addf %107, %112 : vector<2x256xf32>
      %c1_66 = arith.constant 1 : index
      %c0_67 = arith.constant 0 : index
      %c125_68 = arith.constant 125 : index
      %114 = vector.load %arg6[%c1_66, %c0_67, %c125_68] : memref<2x2x512xf32, #tpu.memory_space<vmem>>, vector<1x2x256xf32>
      %115 = vector.shape_cast %114 : vector<1x2x256xf32> to vector<2x256xf32>
      %c70 = arith.constant 70 : index
      %116 = memref.load %arg3[%c70] : memref<98xf32, #tpu.memory_space<smem>>
      %117 = vector.broadcast %116 : f32 to vector<2x256xf32>
      %118 = arith.mulf %117, %115 : vector<2x256xf32>
      %119 = arith.addf %113, %118 : vector<2x256xf32>
      %c1_69 = arith.constant 1 : index
      %c0_70 = arith.constant 0 : index
      %c141_71 = arith.constant 141 : index
      %120 = vector.load %arg6[%c1_69, %c0_70, %c141_71] : memref<2x2x512xf32, #tpu.memory_space<vmem>>, vector<1x2x256xf32>
      %121 = vector.shape_cast %120 : vector<1x2x256xf32> to vector<2x256xf32>
      %c77_72 = arith.constant 77 : index
      %122 = memref.load %arg3[%c77_72] : memref<98xf32, #tpu.memory_space<smem>>
      %123 = vector.broadcast %122 : f32 to vector<2x256xf32>
      %124 = arith.mulf %123, %121 : vector<2x256xf32>
      %125 = arith.addf %119, %124 : vector<2x256xf32>
      %c1_73 = arith.constant 1 : index
      %c0_74 = arith.constant 0 : index
      %c157_75 = arith.constant 157 : index
      %126 = vector.load %arg6[%c1_73, %c0_74, %c157_75] : memref<2x2x512xf32, #tpu.memory_space<vmem>>, vector<1x2x256xf32>
      %127 = vector.shape_cast %126 : vector<1x2x256xf32> to vector<2x256xf32>
      %c84 = arith.constant 84 : index
      %128 = memref.load %arg3[%c84] : memref<98xf32, #tpu.memory_space<smem>>
      %129 = vector.broadcast %128 : f32 to vector<2x256xf32>
      %130 = arith.mulf %129, %127 : vector<2x256xf32>
      %131 = arith.addf %125, %130 : vector<2x256xf32>
      %c1_76 = arith.constant 1 : index
      %c0_77 = arith.constant 0 : index
      %c173_78 = arith.constant 173 : index
      %132 = vector.load %arg6[%c1_76, %c0_77, %c173_78] : memref<2x2x512xf32, #tpu.memory_space<vmem>>, vector<1x2x256xf32>
      %133 = vector.shape_cast %132 : vector<1x2x256xf32> to vector<2x256xf32>
      %c91 = arith.constant 91 : index
      %134 = memref.load %arg3[%c91] : memref<98xf32, #tpu.memory_space<smem>>
      %135 = vector.broadcast %134 : f32 to vector<2x256xf32>
      %136 = arith.mulf %135, %133 : vector<2x256xf32>
      %137 = arith.addf %131, %136 : vector<2x256xf32>
      %cst_79 = arith.constant 0.000000e+00 : f32
      %138 = vector.broadcast %cst_79 : f32 to vector<2x256xf32>
      %139 = arith.select %52, %137, %138 : vector<2x256xi1>, vector<2x256xf32>
      %140 = arith.addf %47, %139 : vector<2x256xf32>
      %c2_i32 = arith.constant 2 : i32
      %141 = vector.broadcast %c2_i32 : i32 to vector<2x256xi32>
      %142 = arith.cmpi sge, %45, %141 : vector<2x256xi32>
      %c18_i32 = arith.constant 18 : i32
      %143 = vector.broadcast %c18_i32 : i32 to vector<2x256xi32>
      %144 = arith.cmpi slt, %45, %143 : vector<2x256xi32>
      %145 = arith.andi %142, %144 : vector<2x256xi1>
      %cst_80 = arith.constant 0.000000e+00 : f32
      %146 = vector.broadcast %cst_80 : f32 to vector<2x256xf32>
      %c0_81 = arith.constant 0 : index
      %c0_82 = arith.constant 0 : index
      %c78 = arith.constant 78 : index
      %147 = vector.load %arg6[%c0_81, %c0_82, %c78] : memref<2x2x512xf32, #tpu.memory_space<vmem>>, vector<1x2x256xf32>
      %148 = vector.shape_cast %147 : vector<1x2x256xf32> to vector<2x256xf32>
      %c1_83 = arith.constant 1 : index
      %149 = memref.load %arg3[%c1_83] : memref<98xf32, #tpu.memory_space<smem>>
      %150 = vector.broadcast %149 : f32 to vector<2x256xf32>
      %151 = arith.mulf %150, %148 : vector<2x256xf32>
      %152 = arith.addf %146, %151 : vector<2x256xf32>
      %c0_84 = arith.constant 0 : index
      %c0_85 = arith.constant 0 : index
      %c94 = arith.constant 94 : index
      %153 = vector.load %arg6[%c0_84, %c0_85, %c94] : memref<2x2x512xf32, #tpu.memory_space<vmem>>, vector<1x2x256xf32>
      %154 = vector.shape_cast %153 : vector<1x2x256xf32> to vector<2x256xf32>
      %c8 = arith.constant 8 : index
      %155 = memref.load %arg3[%c8] : memref<98xf32, #tpu.memory_space<smem>>
      %156 = vector.broadcast %155 : f32 to vector<2x256xf32>
      %157 = arith.mulf %156, %154 : vector<2x256xf32>
      %158 = arith.addf %152, %157 : vector<2x256xf32>
      %c0_86 = arith.constant 0 : index
      %c0_87 = arith.constant 0 : index
      %c110 = arith.constant 110 : index
      %159 = vector.load %arg6[%c0_86, %c0_87, %c110] : memref<2x2x512xf32, #tpu.memory_space<vmem>>, vector<1x2x256xf32>
      %160 = vector.shape_cast %159 : vector<1x2x256xf32> to vector<2x256xf32>
      %c15 = arith.constant 15 : index
      %161 = memref.load %arg3[%c15] : memref<98xf32, #tpu.memory_space<smem>>
      %162 = vector.broadcast %161 : f32 to vector<2x256xf32>
      %163 = arith.mulf %162, %160 : vector<2x256xf32>
      %164 = arith.addf %158, %163 : vector<2x256xf32>
      %c0_88 = arith.constant 0 : index
      %c0_89 = arith.constant 0 : index
      %c126 = arith.constant 126 : index
      %165 = vector.load %arg6[%c0_88, %c0_89, %c126] : memref<2x2x512xf32, #tpu.memory_space<vmem>>, vector<1x2x256xf32>
      %166 = vector.shape_cast %165 : vector<1x2x256xf32> to vector<2x256xf32>
      %c22 = arith.constant 22 : index
      %167 = memref.load %arg3[%c22] : memref<98xf32, #tpu.memory_space<smem>>
      %168 = vector.broadcast %167 : f32 to vector<2x256xf32>
      %169 = arith.mulf %168, %166 : vector<2x256xf32>
      %170 = arith.addf %164, %169 : vector<2x256xf32>
      %c0_90 = arith.constant 0 : index
      %c0_91 = arith.constant 0 : index
      %c142 = arith.constant 142 : index
      %171 = vector.load %arg6[%c0_90, %c0_91, %c142] : memref<2x2x512xf32, #tpu.memory_space<vmem>>, vector<1x2x256xf32>
      %172 = vector.shape_cast %171 : vector<1x2x256xf32> to vector<2x256xf32>
      %c29 = arith.constant 29 : index
      %173 = memref.load %arg3[%c29] : memref<98xf32, #tpu.memory_space<smem>>
      %174 = vector.broadcast %173 : f32 to vector<2x256xf32>
      %175 = arith.mulf %174, %172 : vector<2x256xf32>
      %176 = arith.addf %170, %175 : vector<2x256xf32>
      %c0_92 = arith.constant 0 : index
      %c0_93 = arith.constant 0 : index
      %c158 = arith.constant 158 : index
      %177 = vector.load %arg6[%c0_92, %c0_93, %c158] : memref<2x2x512xf32, #tpu.memory_space<vmem>>, vector<1x2x256xf32>
      %178 = vector.shape_cast %177 : vector<1x2x256xf32> to vector<2x256xf32>
      %c36 = arith.constant 36 : index
      %179 = memref.load %arg3[%c36] : memref<98xf32, #tpu.memory_space<smem>>
      %180 = vector.broadcast %179 : f32 to vector<2x256xf32>
      %181 = arith.mulf %180, %178 : vector<2x256xf32>
      %182 = arith.addf %176, %181 : vector<2x256xf32>
      %c0_94 = arith.constant 0 : index
      %c0_95 = arith.constant 0 : index
      %c174 = arith.constant 174 : index
      %183 = vector.load %arg6[%c0_94, %c0_95, %c174] : memref<2x2x512xf32, #tpu.memory_space<vmem>>, vector<1x2x256xf32>
      %184 = vector.shape_cast %183 : vector<1x2x256xf32> to vector<2x256xf32>
      %c43 = arith.constant 43 : index
      %185 = memref.load %arg3[%c43] : memref<98xf32, #tpu.memory_space<smem>>
      %186 = vector.broadcast %185 : f32 to vector<2x256xf32>
      %187 = arith.mulf %186, %184 : vector<2x256xf32>
      %188 = arith.addf %182, %187 : vector<2x256xf32>
      %c1_96 = arith.constant 1 : index
      %c0_97 = arith.constant 0 : index
      %c78_98 = arith.constant 78 : index
      %189 = vector.load %arg6[%c1_96, %c0_97, %c78_98] : memref<2x2x512xf32, #tpu.memory_space<vmem>>, vector<1x2x256xf32>
      %190 = vector.shape_cast %189 : vector<1x2x256xf32> to vector<2x256xf32>
      %c50 = arith.constant 50 : index
      %191 = memref.load %arg3[%c50] : memref<98xf32, #tpu.memory_space<smem>>
      %192 = vector.broadcast %191 : f32 to vector<2x256xf32>
      %193 = arith.mulf %192, %190 : vector<2x256xf32>
      %194 = arith.addf %188, %193 : vector<2x256xf32>
      %c1_99 = arith.constant 1 : index
      %c0_100 = arith.constant 0 : index
      %c94_101 = arith.constant 94 : index
      %195 = vector.load %arg6[%c1_99, %c0_100, %c94_101] : memref<2x2x512xf32, #tpu.memory_space<vmem>>, vector<1x2x256xf32>
      %196 = vector.shape_cast %195 : vector<1x2x256xf32> to vector<2x256xf32>
      %c57 = arith.constant 57 : index
      %197 = memref.load %arg3[%c57] : memref<98xf32, #tpu.memory_space<smem>>
      %198 = vector.broadcast %197 : f32 to vector<2x256xf32>
      %199 = arith.mulf %198, %196 : vector<2x256xf32>
      %200 = arith.addf %194, %199 : vector<2x256xf32>
      %c1_102 = arith.constant 1 : index
      %c0_103 = arith.constant 0 : index
      %c110_104 = arith.constant 110 : index
      %201 = vector.load %arg6[%c1_102, %c0_103, %c110_104] : memref<2x2x512xf32, #tpu.memory_space<vmem>>, vector<1x2x256xf32>
      %202 = vector.shape_cast %201 : vector<1x2x256xf32> to vector<2x256xf32>
      %c64 = arith.constant 64 : index
      %203 = memref.load %arg3[%c64] : memref<98xf32, #tpu.memory_space<smem>>
      %204 = vector.broadcast %203 : f32 to vector<2x256xf32>
      %205 = arith.mulf %204, %202 : vector<2x256xf32>
      %206 = arith.addf %200, %205 : vector<2x256xf32>
      %c1_105 = arith.constant 1 : index
      %c0_106 = arith.constant 0 : index
      %c126_107 = arith.constant 126 : index
      %207 = vector.load %arg6[%c1_105, %c0_106, %c126_107] : memref<2x2x512xf32, #tpu.memory_space<vmem>>, vector<1x2x256xf32>
      %208 = vector.shape_cast %207 : vector<1x2x256xf32> to vector<2x256xf32>
      %c71 = arith.constant 71 : index
      %209 = memref.load %arg3[%c71] : memref<98xf32, #tpu.memory_space<smem>>
      %210 = vector.broadcast %209 : f32 to vector<2x256xf32>
      %211 = arith.mulf %210, %208 : vector<2x256xf32>
      %212 = arith.addf %206, %211 : vector<2x256xf32>
      %c1_108 = arith.constant 1 : index
      %c0_109 = arith.constant 0 : index
      %c142_110 = arith.constant 142 : index
      %213 = vector.load %arg6[%c1_108, %c0_109, %c142_110] : memref<2x2x512xf32, #tpu.memory_space<vmem>>, vector<1x2x256xf32>
      %214 = vector.shape_cast %213 : vector<1x2x256xf32> to vector<2x256xf32>
      %c78_111 = arith.constant 78 : index
      %215 = memref.load %arg3[%c78_111] : memref<98xf32, #tpu.memory_space<smem>>
      %216 = vector.broadcast %215 : f32 to vector<2x256xf32>
      %217 = arith.mulf %216, %214 : vector<2x256xf32>
      %218 = arith.addf %212, %217 : vector<2x256xf32>
      %c1_112 = arith.constant 1 : index
      %c0_113 = arith.constant 0 : index
      %c158_114 = arith.constant 158 : index
      %219 = vector.load %arg6[%c1_112, %c0_113, %c158_114] : memref<2x2x512xf32, #tpu.memory_space<vmem>>, vector<1x2x256xf32>
      %220 = vector.shape_cast %219 : vector<1x2x256xf32> to vector<2x256xf32>
      %c85 = arith.constant 85 : index
      %221 = memref.load %arg3[%c85] : memref<98xf32, #tpu.memory_space<smem>>
      %222 = vector.broadcast %221 : f32 to vector<2x256xf32>
      %223 = arith.mulf %222, %220 : vector<2x256xf32>
      %224 = arith.addf %218, %223 : vector<2x256xf32>
      %c1_115 = arith.constant 1 : index
      %c0_116 = arith.constant 0 : index
      %c174_117 = arith.constant 174 : index
      %225 = vector.load %arg6[%c1_115, %c0_116, %c174_117] : memref<2x2x512xf32, #tpu.memory_space<vmem>>, vector<1x2x256xf32>
      %226 = vector.shape_cast %225 : vector<1x2x256xf32> to vector<2x256xf32>
      %c92 = arith.constant 92 : index
      %227 = memref.load %arg3[%c92] : memref<98xf32, #tpu.memory_space<smem>>
      %228 = vector.broadcast %227 : f32 to vector<2x256xf32>
      %229 = arith.mulf %228, %226 : vector<2x256xf32>
      %230 = arith.addf %224, %229 : vector<2x256xf32>
      %cst_118 = arith.constant 0.000000e+00 : f32
      %231 = vector.broadcast %cst_118 : f32 to vector<2x256xf32>
      %232 = arith.select %145, %230, %231 : vector<2x256xi1>, vector<2x256xf32>
      %233 = arith.addf %140, %232 : vector<2x256xf32>
      %c1_i32_119 = arith.constant 1 : i32
      %234 = vector.broadcast %c1_i32_119 : i32 to vector<2x256xi32>
      %235 = arith.cmpi sge, %45, %234 : vector<2x256xi32>
      %c17_i32 = arith.constant 17 : i32
      %236 = vector.broadcast %c17_i32 : i32 to vector<2x256xi32>
      %237 = arith.cmpi slt, %45, %236 : vector<2x256xi32>
      %238 = arith.andi %235, %237 : vector<2x256xi1>
      %cst_120 = arith.constant 0.000000e+00 : f32
      %239 = vector.broadcast %cst_120 : f32 to vector<2x256xf32>
      %c0_121 = arith.constant 0 : index
      %c0_122 = arith.constant 0 : index
      %c79 = arith.constant 79 : index
      %240 = vector.load %arg6[%c0_121, %c0_122, %c79] : memref<2x2x512xf32, #tpu.memory_space<vmem>>, vector<1x2x256xf32>
      %241 = vector.shape_cast %240 : vector<1x2x256xf32> to vector<2x256xf32>
      %c2 = arith.constant 2 : index
      %242 = memref.load %arg3[%c2] : memref<98xf32, #tpu.memory_space<smem>>
      %243 = vector.broadcast %242 : f32 to vector<2x256xf32>
      %244 = arith.mulf %243, %241 : vector<2x256xf32>
      %245 = arith.addf %239, %244 : vector<2x256xf32>
      %c0_123 = arith.constant 0 : index
      %c0_124 = arith.constant 0 : index
      %c95 = arith.constant 95 : index
      %246 = vector.load %arg6[%c0_123, %c0_124, %c95] : memref<2x2x512xf32, #tpu.memory_space<vmem>>, vector<1x2x256xf32>
      %247 = vector.shape_cast %246 : vector<1x2x256xf32> to vector<2x256xf32>
      %c9 = arith.constant 9 : index
      %248 = memref.load %arg3[%c9] : memref<98xf32, #tpu.memory_space<smem>>
      %249 = vector.broadcast %248 : f32 to vector<2x256xf32>
      %250 = arith.mulf %249, %247 : vector<2x256xf32>
      %251 = arith.addf %245, %250 : vector<2x256xf32>
      %c0_125 = arith.constant 0 : index
      %c0_126 = arith.constant 0 : index
      %c111 = arith.constant 111 : index
      %252 = vector.load %arg6[%c0_125, %c0_126, %c111] : memref<2x2x512xf32, #tpu.memory_space<vmem>>, vector<1x2x256xf32>
      %253 = vector.shape_cast %252 : vector<1x2x256xf32> to vector<2x256xf32>
      %c16 = arith.constant 16 : index
      %254 = memref.load %arg3[%c16] : memref<98xf32, #tpu.memory_space<smem>>
      %255 = vector.broadcast %254 : f32 to vector<2x256xf32>
      %256 = arith.mulf %255, %253 : vector<2x256xf32>
      %257 = arith.addf %251, %256 : vector<2x256xf32>
      %c0_127 = arith.constant 0 : index
      %c0_128 = arith.constant 0 : index
      %c127 = arith.constant 127 : index
      %258 = vector.load %arg6[%c0_127, %c0_128, %c127] : memref<2x2x512xf32, #tpu.memory_space<vmem>>, vector<1x2x256xf32>
      %259 = vector.shape_cast %258 : vector<1x2x256xf32> to vector<2x256xf32>
      %c23 = arith.constant 23 : index
      %260 = memref.load %arg3[%c23] : memref<98xf32, #tpu.memory_space<smem>>
      %261 = vector.broadcast %260 : f32 to vector<2x256xf32>
      %262 = arith.mulf %261, %259 : vector<2x256xf32>
      %263 = arith.addf %257, %262 : vector<2x256xf32>
      %c0_129 = arith.constant 0 : index
      %c0_130 = arith.constant 0 : index
      %c143 = arith.constant 143 : index
      %264 = vector.load %arg6[%c0_129, %c0_130, %c143] : memref<2x2x512xf32, #tpu.memory_space<vmem>>, vector<1x2x256xf32>
      %265 = vector.shape_cast %264 : vector<1x2x256xf32> to vector<2x256xf32>
      %c30 = arith.constant 30 : index
      %266 = memref.load %arg3[%c30] : memref<98xf32, #tpu.memory_space<smem>>
      %267 = vector.broadcast %266 : f32 to vector<2x256xf32>
      %268 = arith.mulf %267, %265 : vector<2x256xf32>
      %269 = arith.addf %263, %268 : vector<2x256xf32>
      %c0_131 = arith.constant 0 : index
      %c0_132 = arith.constant 0 : index
      %c159 = arith.constant 159 : index
      %270 = vector.load %arg6[%c0_131, %c0_132, %c159] : memref<2x2x512xf32, #tpu.memory_space<vmem>>, vector<1x2x256xf32>
      %271 = vector.shape_cast %270 : vector<1x2x256xf32> to vector<2x256xf32>
      %c37 = arith.constant 37 : index
      %272 = memref.load %arg3[%c37] : memref<98xf32, #tpu.memory_space<smem>>
      %273 = vector.broadcast %272 : f32 to vector<2x256xf32>
      %274 = arith.mulf %273, %271 : vector<2x256xf32>
      %275 = arith.addf %269, %274 : vector<2x256xf32>
      %c0_133 = arith.constant 0 : index
      %c0_134 = arith.constant 0 : index
      %c175 = arith.constant 175 : index
      %276 = vector.load %arg6[%c0_133, %c0_134, %c175] : memref<2x2x512xf32, #tpu.memory_space<vmem>>, vector<1x2x256xf32>
      %277 = vector.shape_cast %276 : vector<1x2x256xf32> to vector<2x256xf32>
      %c44 = arith.constant 44 : index
      %278 = memref.load %arg3[%c44] : memref<98xf32, #tpu.memory_space<smem>>
      %279 = vector.broadcast %278 : f32 to vector<2x256xf32>
      %280 = arith.mulf %279, %277 : vector<2x256xf32>
      %281 = arith.addf %275, %280 : vector<2x256xf32>
      %c1_135 = arith.constant 1 : index
      %c0_136 = arith.constant 0 : index
      %c79_137 = arith.constant 79 : index
      %282 = vector.load %arg6[%c1_135, %c0_136, %c79_137] : memref<2x2x512xf32, #tpu.memory_space<vmem>>, vector<1x2x256xf32>
      %283 = vector.shape_cast %282 : vector<1x2x256xf32> to vector<2x256xf32>
      %c51 = arith.constant 51 : index
      %284 = memref.load %arg3[%c51] : memref<98xf32, #tpu.memory_space<smem>>
      %285 = vector.broadcast %284 : f32 to vector<2x256xf32>
      %286 = arith.mulf %285, %283 : vector<2x256xf32>
      %287 = arith.addf %281, %286 : vector<2x256xf32>
      %c1_138 = arith.constant 1 : index
      %c0_139 = arith.constant 0 : index
      %c95_140 = arith.constant 95 : index
      %288 = vector.load %arg6[%c1_138, %c0_139, %c95_140] : memref<2x2x512xf32, #tpu.memory_space<vmem>>, vector<1x2x256xf32>
      %289 = vector.shape_cast %288 : vector<1x2x256xf32> to vector<2x256xf32>
      %c58 = arith.constant 58 : index
      %290 = memref.load %arg3[%c58] : memref<98xf32, #tpu.memory_space<smem>>
      %291 = vector.broadcast %290 : f32 to vector<2x256xf32>
      %292 = arith.mulf %291, %289 : vector<2x256xf32>
      %293 = arith.addf %287, %292 : vector<2x256xf32>
      %c1_141 = arith.constant 1 : index
      %c0_142 = arith.constant 0 : index
      %c111_143 = arith.constant 111 : index
      %294 = vector.load %arg6[%c1_141, %c0_142, %c111_143] : memref<2x2x512xf32, #tpu.memory_space<vmem>>, vector<1x2x256xf32>
      %295 = vector.shape_cast %294 : vector<1x2x256xf32> to vector<2x256xf32>
      %c65 = arith.constant 65 : index
      %296 = memref.load %arg3[%c65] : memref<98xf32, #tpu.memory_space<smem>>
      %297 = vector.broadcast %296 : f32 to vector<2x256xf32>
      %298 = arith.mulf %297, %295 : vector<2x256xf32>
      %299 = arith.addf %293, %298 : vector<2x256xf32>
      %c1_144 = arith.constant 1 : index
      %c0_145 = arith.constant 0 : index
      %c127_146 = arith.constant 127 : index
      %300 = vector.load %arg6[%c1_144, %c0_145, %c127_146] : memref<2x2x512xf32, #tpu.memory_space<vmem>>, vector<1x2x256xf32>
      %301 = vector.shape_cast %300 : vector<1x2x256xf32> to vector<2x256xf32>
      %c72 = arith.constant 72 : index
      %302 = memref.load %arg3[%c72] : memref<98xf32, #tpu.memory_space<smem>>
      %303 = vector.broadcast %302 : f32 to vector<2x256xf32>
      %304 = arith.mulf %303, %301 : vector<2x256xf32>
      %305 = arith.addf %299, %304 : vector<2x256xf32>
      %c1_147 = arith.constant 1 : index
      %c0_148 = arith.constant 0 : index
      %c143_149 = arith.constant 143 : index
      %306 = vector.load %arg6[%c1_147, %c0_148, %c143_149] : memref<2x2x512xf32, #tpu.memory_space<vmem>>, vector<1x2x256xf32>
      %307 = vector.shape_cast %306 : vector<1x2x256xf32> to vector<2x256xf32>
      %c79_150 = arith.constant 79 : index
      %308 = memref.load %arg3[%c79_150] : memref<98xf32, #tpu.memory_space<smem>>
      %309 = vector.broadcast %308 : f32 to vector<2x256xf32>
      %310 = arith.mulf %309, %307 : vector<2x256xf32>
      %311 = arith.addf %305, %310 : vector<2x256xf32>
      %c1_151 = arith.constant 1 : index
      %c0_152 = arith.constant 0 : index
      %c159_153 = arith.constant 159 : index
      %312 = vector.load %arg6[%c1_151, %c0_152, %c159_153] : memref<2x2x512xf32, #tpu.memory_space<vmem>>, vector<1x2x256xf32>
      %313 = vector.shape_cast %312 : vector<1x2x256xf32> to vector<2x256xf32>
      %c86 = arith.constant 86 : index
      %314 = memref.load %arg3[%c86] : memref<98xf32, #tpu.memory_space<smem>>
      %315 = vector.broadcast %314 : f32 to vector<2x256xf32>
      %316 = arith.mulf %315, %313 : vector<2x256xf32>
      %317 = arith.addf %311, %316 : vector<2x256xf32>
      %c1_154 = arith.constant 1 : index
      %c0_155 = arith.constant 0 : index
      %c175_156 = arith.constant 175 : index
      %318 = vector.load %arg6[%c1_154, %c0_155, %c175_156] : memref<2x2x512xf32, #tpu.memory_space<vmem>>, vector<1x2x256xf32>
      %319 = vector.shape_cast %318 : vector<1x2x256xf32> to vector<2x256xf32>
      %c93_157 = arith.constant 93 : index
      %320 = memref.load %arg3[%c93_157] : memref<98xf32, #tpu.memory_space<smem>>
      %321 = vector.broadcast %320 : f32 to vector<2x256xf32>
      %322 = arith.mulf %321, %319 : vector<2x256xf32>
      %323 = arith.addf %317, %322 : vector<2x256xf32>
      %cst_158 = arith.constant 0.000000e+00 : f32
      %324 = vector.broadcast %cst_158 : f32 to vector<2x256xf32>
      %325 = arith.select %238, %323, %324 : vector<2x256xi1>, vector<2x256xf32>
      %326 = arith.addf %233, %325 : vector<2x256xf32>
      %c0_i32_159 = arith.constant 0 : i32
      %327 = vector.broadcast %c0_i32_159 : i32 to vector<2x256xi32>
      %328 = arith.cmpi sge, %45, %327 : vector<2x256xi32>
      %c16_i32_160 = arith.constant 16 : i32
      %329 = vector.broadcast %c16_i32_160 : i32 to vector<2x256xi32>
      %330 = arith.cmpi slt, %45, %329 : vector<2x256xi32>
      %331 = arith.andi %328, %330 : vector<2x256xi1>
      %cst_161 = arith.constant 0.000000e+00 : f32
      %332 = vector.broadcast %cst_161 : f32 to vector<2x256xf32>
      %c0_162 = arith.constant 0 : index
      %c0_163 = arith.constant 0 : index
      %c80 = arith.constant 80 : index
      %333 = vector.load %arg6[%c0_162, %c0_163, %c80] : memref<2x2x512xf32, #tpu.memory_space<vmem>>, vector<1x2x256xf32>
      %334 = vector.shape_cast %333 : vector<1x2x256xf32> to vector<2x256xf32>
      %c3 = arith.constant 3 : index
      %335 = memref.load %arg3[%c3] : memref<98xf32, #tpu.memory_space<smem>>
      %336 = vector.broadcast %335 : f32 to vector<2x256xf32>
      %337 = arith.mulf %336, %334 : vector<2x256xf32>
      %338 = arith.addf %332, %337 : vector<2x256xf32>
      %c0_164 = arith.constant 0 : index
      %c0_165 = arith.constant 0 : index
      %c96 = arith.constant 96 : index
      %339 = vector.load %arg6[%c0_164, %c0_165, %c96] : memref<2x2x512xf32, #tpu.memory_space<vmem>>, vector<1x2x256xf32>
      %340 = vector.shape_cast %339 : vector<1x2x256xf32> to vector<2x256xf32>
      %c10 = arith.constant 10 : index
      %341 = memref.load %arg3[%c10] : memref<98xf32, #tpu.memory_space<smem>>
      %342 = vector.broadcast %341 : f32 to vector<2x256xf32>
      %343 = arith.mulf %342, %340 : vector<2x256xf32>
      %344 = arith.addf %338, %343 : vector<2x256xf32>
      %c0_166 = arith.constant 0 : index
      %c0_167 = arith.constant 0 : index
      %c112 = arith.constant 112 : index
      %345 = vector.load %arg6[%c0_166, %c0_167, %c112] : memref<2x2x512xf32, #tpu.memory_space<vmem>>, vector<1x2x256xf32>
      %346 = vector.shape_cast %345 : vector<1x2x256xf32> to vector<2x256xf32>
      %c17 = arith.constant 17 : index
      %347 = memref.load %arg3[%c17] : memref<98xf32, #tpu.memory_space<smem>>
      %348 = vector.broadcast %347 : f32 to vector<2x256xf32>
      %349 = arith.mulf %348, %346 : vector<2x256xf32>
      %350 = arith.addf %344, %349 : vector<2x256xf32>
      %c0_168 = arith.constant 0 : index
      %c0_169 = arith.constant 0 : index
      %c128_170 = arith.constant 128 : index
      %351 = vector.load %arg6[%c0_168, %c0_169, %c128_170] : memref<2x2x512xf32, #tpu.memory_space<vmem>>, vector<1x2x256xf32>
      %352 = vector.shape_cast %351 : vector<1x2x256xf32> to vector<2x256xf32>
      %c24 = arith.constant 24 : index
      %353 = memref.load %arg3[%c24] : memref<98xf32, #tpu.memory_space<smem>>
      %354 = vector.broadcast %353 : f32 to vector<2x256xf32>
      %355 = arith.mulf %354, %352 : vector<2x256xf32>
      %356 = arith.addf %350, %355 : vector<2x256xf32>
      %c0_171 = arith.constant 0 : index
      %c0_172 = arith.constant 0 : index
      %c144 = arith.constant 144 : index
      %357 = vector.load %arg6[%c0_171, %c0_172, %c144] : memref<2x2x512xf32, #tpu.memory_space<vmem>>, vector<1x2x256xf32>
      %358 = vector.shape_cast %357 : vector<1x2x256xf32> to vector<2x256xf32>
      %c31 = arith.constant 31 : index
      %359 = memref.load %arg3[%c31] : memref<98xf32, #tpu.memory_space<smem>>
      %360 = vector.broadcast %359 : f32 to vector<2x256xf32>
      %361 = arith.mulf %360, %358 : vector<2x256xf32>
      %362 = arith.addf %356, %361 : vector<2x256xf32>
      %c0_173 = arith.constant 0 : index
      %c0_174 = arith.constant 0 : index
      %c160 = arith.constant 160 : index
      %363 = vector.load %arg6[%c0_173, %c0_174, %c160] : memref<2x2x512xf32, #tpu.memory_space<vmem>>, vector<1x2x256xf32>
      %364 = vector.shape_cast %363 : vector<1x2x256xf32> to vector<2x256xf32>
      %c38 = arith.constant 38 : index
      %365 = memref.load %arg3[%c38] : memref<98xf32, #tpu.memory_space<smem>>
      %366 = vector.broadcast %365 : f32 to vector<2x256xf32>
      %367 = arith.mulf %366, %364 : vector<2x256xf32>
      %368 = arith.addf %362, %367 : vector<2x256xf32>
      %c0_175 = arith.constant 0 : index
      %c0_176 = arith.constant 0 : index
      %c176 = arith.constant 176 : index
      %369 = vector.load %arg6[%c0_175, %c0_176, %c176] : memref<2x2x512xf32, #tpu.memory_space<vmem>>, vector<1x2x256xf32>
      %370 = vector.shape_cast %369 : vector<1x2x256xf32> to vector<2x256xf32>
      %c45 = arith.constant 45 : index
      %371 = memref.load %arg3[%c45] : memref<98xf32, #tpu.memory_space<smem>>
      %372 = vector.broadcast %371 : f32 to vector<2x256xf32>
      %373 = arith.mulf %372, %370 : vector<2x256xf32>
      %374 = arith.addf %368, %373 : vector<2x256xf32>
      %c1_177 = arith.constant 1 : index
      %c0_178 = arith.constant 0 : index
      %c80_179 = arith.constant 80 : index
      %375 = vector.load %arg6[%c1_177, %c0_178, %c80_179] : memref<2x2x512xf32, #tpu.memory_space<vmem>>, vector<1x2x256xf32>
      %376 = vector.shape_cast %375 : vector<1x2x256xf32> to vector<2x256xf32>
      %c52 = arith.constant 52 : index
      %377 = memref.load %arg3[%c52] : memref<98xf32, #tpu.memory_space<smem>>
      %378 = vector.broadcast %377 : f32 to vector<2x256xf32>
      %379 = arith.mulf %378, %376 : vector<2x256xf32>
      %380 = arith.addf %374, %379 : vector<2x256xf32>
      %c1_180 = arith.constant 1 : index
      %c0_181 = arith.constant 0 : index
      %c96_182 = arith.constant 96 : index
      %381 = vector.load %arg6[%c1_180, %c0_181, %c96_182] : memref<2x2x512xf32, #tpu.memory_space<vmem>>, vector<1x2x256xf32>
      %382 = vector.shape_cast %381 : vector<1x2x256xf32> to vector<2x256xf32>
      %c59 = arith.constant 59 : index
      %383 = memref.load %arg3[%c59] : memref<98xf32, #tpu.memory_space<smem>>
      %384 = vector.broadcast %383 : f32 to vector<2x256xf32>
      %385 = arith.mulf %384, %382 : vector<2x256xf32>
      %386 = arith.addf %380, %385 : vector<2x256xf32>
      %c1_183 = arith.constant 1 : index
      %c0_184 = arith.constant 0 : index
      %c112_185 = arith.constant 112 : index
      %387 = vector.load %arg6[%c1_183, %c0_184, %c112_185] : memref<2x2x512xf32, #tpu.memory_space<vmem>>, vector<1x2x256xf32>
      %388 = vector.shape_cast %387 : vector<1x2x256xf32> to vector<2x256xf32>
      %c66 = arith.constant 66 : index
      %389 = memref.load %arg3[%c66] : memref<98xf32, #tpu.memory_space<smem>>
      %390 = vector.broadcast %389 : f32 to vector<2x256xf32>
      %391 = arith.mulf %390, %388 : vector<2x256xf32>
      %392 = arith.addf %386, %391 : vector<2x256xf32>
      %c1_186 = arith.constant 1 : index
      %c0_187 = arith.constant 0 : index
      %c128_188 = arith.constant 128 : index
      %393 = vector.load %arg6[%c1_186, %c0_187, %c128_188] : memref<2x2x512xf32, #tpu.memory_space<vmem>>, vector<1x2x256xf32>
      %394 = vector.shape_cast %393 : vector<1x2x256xf32> to vector<2x256xf32>
      %c73 = arith.constant 73 : index
      %395 = memref.load %arg3[%c73] : memref<98xf32, #tpu.memory_space<smem>>
      %396 = vector.broadcast %395 : f32 to vector<2x256xf32>
      %397 = arith.mulf %396, %394 : vector<2x256xf32>
      %398 = arith.addf %392, %397 : vector<2x256xf32>
      %c1_189 = arith.constant 1 : index
      %c0_190 = arith.constant 0 : index
      %c144_191 = arith.constant 144 : index
      %399 = vector.load %arg6[%c1_189, %c0_190, %c144_191] : memref<2x2x512xf32, #tpu.memory_space<vmem>>, vector<1x2x256xf32>
      %400 = vector.shape_cast %399 : vector<1x2x256xf32> to vector<2x256xf32>
      %c80_192 = arith.constant 80 : index
      %401 = memref.load %arg3[%c80_192] : memref<98xf32, #tpu.memory_space<smem>>
      %402 = vector.broadcast %401 : f32 to vector<2x256xf32>
      %403 = arith.mulf %402, %400 : vector<2x256xf32>
      %404 = arith.addf %398, %403 : vector<2x256xf32>
      %c1_193 = arith.constant 1 : index
      %c0_194 = arith.constant 0 : index
      %c160_195 = arith.constant 160 : index
      %405 = vector.load %arg6[%c1_193, %c0_194, %c160_195] : memref<2x2x512xf32, #tpu.memory_space<vmem>>, vector<1x2x256xf32>
      %406 = vector.shape_cast %405 : vector<1x2x256xf32> to vector<2x256xf32>
      %c87 = arith.constant 87 : index
      %407 = memref.load %arg3[%c87] : memref<98xf32, #tpu.memory_space<smem>>
      %408 = vector.broadcast %407 : f32 to vector<2x256xf32>
      %409 = arith.mulf %408, %406 : vector<2x256xf32>
      %410 = arith.addf %404, %409 : vector<2x256xf32>
      %c1_196 = arith.constant 1 : index
      %c0_197 = arith.constant 0 : index
      %c176_198 = arith.constant 176 : index
      %411 = vector.load %arg6[%c1_196, %c0_197, %c176_198] : memref<2x2x512xf32, #tpu.memory_space<vmem>>, vector<1x2x256xf32>
      %412 = vector.shape_cast %411 : vector<1x2x256xf32> to vector<2x256xf32>
      %c94_199 = arith.constant 94 : index
      %413 = memref.load %arg3[%c94_199] : memref<98xf32, #tpu.memory_space<smem>>
      %414 = vector.broadcast %413 : f32 to vector<2x256xf32>
      %415 = arith.mulf %414, %412 : vector<2x256xf32>
      %416 = arith.addf %410, %415 : vector<2x256xf32>
      %cst_200 = arith.constant 0.000000e+00 : f32
      %417 = vector.broadcast %cst_200 : f32 to vector<2x256xf32>
      %418 = arith.select %331, %416, %417 : vector<2x256xi1>, vector<2x256xf32>
      %419 = arith.addf %326, %418 : vector<2x256xf32>
      %c-1_i32 = arith.constant -1 : i32
      %420 = vector.broadcast %c-1_i32 : i32 to vector<2x256xi32>
      %421 = arith.cmpi sge, %45, %420 : vector<2x256xi32>
      %c15_i32 = arith.constant 15 : i32
      %422 = vector.broadcast %c15_i32 : i32 to vector<2x256xi32>
      %423 = arith.cmpi slt, %45, %422 : vector<2x256xi32>
      %424 = arith.andi %421, %423 : vector<2x256xi1>
      %cst_201 = arith.constant 0.000000e+00 : f32
      %425 = vector.broadcast %cst_201 : f32 to vector<2x256xf32>
      %c0_202 = arith.constant 0 : index
      %c0_203 = arith.constant 0 : index
      %c81 = arith.constant 81 : index
      %426 = vector.load %arg6[%c0_202, %c0_203, %c81] : memref<2x2x512xf32, #tpu.memory_space<vmem>>, vector<1x2x256xf32>
      %427 = vector.shape_cast %426 : vector<1x2x256xf32> to vector<2x256xf32>
      %c4 = arith.constant 4 : index
      %428 = memref.load %arg3[%c4] : memref<98xf32, #tpu.memory_space<smem>>
      %429 = vector.broadcast %428 : f32 to vector<2x256xf32>
      %430 = arith.mulf %429, %427 : vector<2x256xf32>
      %431 = arith.addf %425, %430 : vector<2x256xf32>
      %c0_204 = arith.constant 0 : index
      %c0_205 = arith.constant 0 : index
      %c97 = arith.constant 97 : index
      %432 = vector.load %arg6[%c0_204, %c0_205, %c97] : memref<2x2x512xf32, #tpu.memory_space<vmem>>, vector<1x2x256xf32>
      %433 = vector.shape_cast %432 : vector<1x2x256xf32> to vector<2x256xf32>
      %c11 = arith.constant 11 : index
      %434 = memref.load %arg3[%c11] : memref<98xf32, #tpu.memory_space<smem>>
      %435 = vector.broadcast %434 : f32 to vector<2x256xf32>
      %436 = arith.mulf %435, %433 : vector<2x256xf32>
      %437 = arith.addf %431, %436 : vector<2x256xf32>
      %c0_206 = arith.constant 0 : index
      %c0_207 = arith.constant 0 : index
      %c113 = arith.constant 113 : index
      %438 = vector.load %arg6[%c0_206, %c0_207, %c113] : memref<2x2x512xf32, #tpu.memory_space<vmem>>, vector<1x2x256xf32>
      %439 = vector.shape_cast %438 : vector<1x2x256xf32> to vector<2x256xf32>
      %c18 = arith.constant 18 : index
      %440 = memref.load %arg3[%c18] : memref<98xf32, #tpu.memory_space<smem>>
      %441 = vector.broadcast %440 : f32 to vector<2x256xf32>
      %442 = arith.mulf %441, %439 : vector<2x256xf32>
      %443 = arith.addf %437, %442 : vector<2x256xf32>
      %c0_208 = arith.constant 0 : index
      %c0_209 = arith.constant 0 : index
      %c129 = arith.constant 129 : index
      %444 = vector.load %arg6[%c0_208, %c0_209, %c129] : memref<2x2x512xf32, #tpu.memory_space<vmem>>, vector<1x2x256xf32>
      %445 = vector.shape_cast %444 : vector<1x2x256xf32> to vector<2x256xf32>
      %c25 = arith.constant 25 : index
      %446 = memref.load %arg3[%c25] : memref<98xf32, #tpu.memory_space<smem>>
      %447 = vector.broadcast %446 : f32 to vector<2x256xf32>
      %448 = arith.mulf %447, %445 : vector<2x256xf32>
      %449 = arith.addf %443, %448 : vector<2x256xf32>
      %c0_210 = arith.constant 0 : index
      %c0_211 = arith.constant 0 : index
      %c145 = arith.constant 145 : index
      %450 = vector.load %arg6[%c0_210, %c0_211, %c145] : memref<2x2x512xf32, #tpu.memory_space<vmem>>, vector<1x2x256xf32>
      %451 = vector.shape_cast %450 : vector<1x2x256xf32> to vector<2x256xf32>
      %c32 = arith.constant 32 : index
      %452 = memref.load %arg3[%c32] : memref<98xf32, #tpu.memory_space<smem>>
      %453 = vector.broadcast %452 : f32 to vector<2x256xf32>
      %454 = arith.mulf %453, %451 : vector<2x256xf32>
      %455 = arith.addf %449, %454 : vector<2x256xf32>
      %c0_212 = arith.constant 0 : index
      %c0_213 = arith.constant 0 : index
      %c161 = arith.constant 161 : index
      %456 = vector.load %arg6[%c0_212, %c0_213, %c161] : memref<2x2x512xf32, #tpu.memory_space<vmem>>, vector<1x2x256xf32>
      %457 = vector.shape_cast %456 : vector<1x2x256xf32> to vector<2x256xf32>
      %c39 = arith.constant 39 : index
      %458 = memref.load %arg3[%c39] : memref<98xf32, #tpu.memory_space<smem>>
      %459 = vector.broadcast %458 : f32 to vector<2x256xf32>
      %460 = arith.mulf %459, %457 : vector<2x256xf32>
      %461 = arith.addf %455, %460 : vector<2x256xf32>
      %c0_214 = arith.constant 0 : index
      %c0_215 = arith.constant 0 : index
      %c177 = arith.constant 177 : index
      %462 = vector.load %arg6[%c0_214, %c0_215, %c177] : memref<2x2x512xf32, #tpu.memory_space<vmem>>, vector<1x2x256xf32>
      %463 = vector.shape_cast %462 : vector<1x2x256xf32> to vector<2x256xf32>
      %c46 = arith.constant 46 : index
      %464 = memref.load %arg3[%c46] : memref<98xf32, #tpu.memory_space<smem>>
      %465 = vector.broadcast %464 : f32 to vector<2x256xf32>
      %466 = arith.mulf %465, %463 : vector<2x256xf32>
      %467 = arith.addf %461, %466 : vector<2x256xf32>
      %c1_216 = arith.constant 1 : index
      %c0_217 = arith.constant 0 : index
      %c81_218 = arith.constant 81 : index
      %468 = vector.load %arg6[%c1_216, %c0_217, %c81_218] : memref<2x2x512xf32, #tpu.memory_space<vmem>>, vector<1x2x256xf32>
      %469 = vector.shape_cast %468 : vector<1x2x256xf32> to vector<2x256xf32>
      %c53 = arith.constant 53 : index
      %470 = memref.load %arg3[%c53] : memref<98xf32, #tpu.memory_space<smem>>
      %471 = vector.broadcast %470 : f32 to vector<2x256xf32>
      %472 = arith.mulf %471, %469 : vector<2x256xf32>
      %473 = arith.addf %467, %472 : vector<2x256xf32>
      %c1_219 = arith.constant 1 : index
      %c0_220 = arith.constant 0 : index
      %c97_221 = arith.constant 97 : index
      %474 = vector.load %arg6[%c1_219, %c0_220, %c97_221] : memref<2x2x512xf32, #tpu.memory_space<vmem>>, vector<1x2x256xf32>
      %475 = vector.shape_cast %474 : vector<1x2x256xf32> to vector<2x256xf32>
      %c60 = arith.constant 60 : index
      %476 = memref.load %arg3[%c60] : memref<98xf32, #tpu.memory_space<smem>>
      %477 = vector.broadcast %476 : f32 to vector<2x256xf32>
      %478 = arith.mulf %477, %475 : vector<2x256xf32>
      %479 = arith.addf %473, %478 : vector<2x256xf32>
      %c1_222 = arith.constant 1 : index
      %c0_223 = arith.constant 0 : index
      %c113_224 = arith.constant 113 : index
      %480 = vector.load %arg6[%c1_222, %c0_223, %c113_224] : memref<2x2x512xf32, #tpu.memory_space<vmem>>, vector<1x2x256xf32>
      %481 = vector.shape_cast %480 : vector<1x2x256xf32> to vector<2x256xf32>
      %c67 = arith.constant 67 : index
      %482 = memref.load %arg3[%c67] : memref<98xf32, #tpu.memory_space<smem>>
      %483 = vector.broadcast %482 : f32 to vector<2x256xf32>
      %484 = arith.mulf %483, %481 : vector<2x256xf32>
      %485 = arith.addf %479, %484 : vector<2x256xf32>
      %c1_225 = arith.constant 1 : index
      %c0_226 = arith.constant 0 : index
      %c129_227 = arith.constant 129 : index
      %486 = vector.load %arg6[%c1_225, %c0_226, %c129_227] : memref<2x2x512xf32, #tpu.memory_space<vmem>>, vector<1x2x256xf32>
      %487 = vector.shape_cast %486 : vector<1x2x256xf32> to vector<2x256xf32>
      %c74 = arith.constant 74 : index
      %488 = memref.load %arg3[%c74] : memref<98xf32, #tpu.memory_space<smem>>
      %489 = vector.broadcast %488 : f32 to vector<2x256xf32>
      %490 = arith.mulf %489, %487 : vector<2x256xf32>
      %491 = arith.addf %485, %490 : vector<2x256xf32>
      %c1_228 = arith.constant 1 : index
      %c0_229 = arith.constant 0 : index
      %c145_230 = arith.constant 145 : index
      %492 = vector.load %arg6[%c1_228, %c0_229, %c145_230] : memref<2x2x512xf32, #tpu.memory_space<vmem>>, vector<1x2x256xf32>
      %493 = vector.shape_cast %492 : vector<1x2x256xf32> to vector<2x256xf32>
      %c81_231 = arith.constant 81 : index
      %494 = memref.load %arg3[%c81_231] : memref<98xf32, #tpu.memory_space<smem>>
      %495 = vector.broadcast %494 : f32 to vector<2x256xf32>
      %496 = arith.mulf %495, %493 : vector<2x256xf32>
      %497 = arith.addf %491, %496 : vector<2x256xf32>
      %c1_232 = arith.constant 1 : index
      %c0_233 = arith.constant 0 : index
      %c161_234 = arith.constant 161 : index
      %498 = vector.load %arg6[%c1_232, %c0_233, %c161_234] : memref<2x2x512xf32, #tpu.memory_space<vmem>>, vector<1x2x256xf32>
      %499 = vector.shape_cast %498 : vector<1x2x256xf32> to vector<2x256xf32>
      %c88 = arith.constant 88 : index
      %500 = memref.load %arg3[%c88] : memref<98xf32, #tpu.memory_space<smem>>
      %501 = vector.broadcast %500 : f32 to vector<2x256xf32>
      %502 = arith.mulf %501, %499 : vector<2x256xf32>
      %503 = arith.addf %497, %502 : vector<2x256xf32>
      %c1_235 = arith.constant 1 : index
      %c0_236 = arith.constant 0 : index
      %c177_237 = arith.constant 177 : index
      %504 = vector.load %arg6[%c1_235, %c0_236, %c177_237] : memref<2x2x512xf32, #tpu.memory_space<vmem>>, vector<1x2x256xf32>
      %505 = vector.shape_cast %504 : vector<1x2x256xf32> to vector<2x256xf32>
      %c95_238 = arith.constant 95 : index
      %506 = memref.load %arg3[%c95_238] : memref<98xf32, #tpu.memory_space<smem>>
      %507 = vector.broadcast %506 : f32 to vector<2x256xf32>
      %508 = arith.mulf %507, %505 : vector<2x256xf32>
      %509 = arith.addf %503, %508 : vector<2x256xf32>
      %cst_239 = arith.constant 0.000000e+00 : f32
      %510 = vector.broadcast %cst_239 : f32 to vector<2x256xf32>
      %511 = arith.select %424, %509, %510 : vector<2x256xi1>, vector<2x256xf32>
      %512 = arith.addf %419, %511 : vector<2x256xf32>
      %c-2_i32 = arith.constant -2 : i32
      %513 = vector.broadcast %c-2_i32 : i32 to vector<2x256xi32>
      %514 = arith.cmpi sge, %45, %513 : vector<2x256xi32>
      %c14_i32 = arith.constant 14 : i32
      %515 = vector.broadcast %c14_i32 : i32 to vector<2x256xi32>
      %516 = arith.cmpi slt, %45, %515 : vector<2x256xi32>
      %517 = arith.andi %514, %516 : vector<2x256xi1>
      %cst_240 = arith.constant 0.000000e+00 : f32
      %518 = vector.broadcast %cst_240 : f32 to vector<2x256xf32>
      %c0_241 = arith.constant 0 : index
      %c0_242 = arith.constant 0 : index
      %c82 = arith.constant 82 : index
      %519 = vector.load %arg6[%c0_241, %c0_242, %c82] : memref<2x2x512xf32, #tpu.memory_space<vmem>>, vector<1x2x256xf32>
      %520 = vector.shape_cast %519 : vector<1x2x256xf32> to vector<2x256xf32>
      %c5 = arith.constant 5 : index
      %521 = memref.load %arg3[%c5] : memref<98xf32, #tpu.memory_space<smem>>
      %522 = vector.broadcast %521 : f32 to vector<2x256xf32>
      %523 = arith.mulf %522, %520 : vector<2x256xf32>
      %524 = arith.addf %518, %523 : vector<2x256xf32>
      %c0_243 = arith.constant 0 : index
      %c0_244 = arith.constant 0 : index
      %c98 = arith.constant 98 : index
      %525 = vector.load %arg6[%c0_243, %c0_244, %c98] : memref<2x2x512xf32, #tpu.memory_space<vmem>>, vector<1x2x256xf32>
      %526 = vector.shape_cast %525 : vector<1x2x256xf32> to vector<2x256xf32>
      %c12 = arith.constant 12 : index
      %527 = memref.load %arg3[%c12] : memref<98xf32, #tpu.memory_space<smem>>
      %528 = vector.broadcast %527 : f32 to vector<2x256xf32>
      %529 = arith.mulf %528, %526 : vector<2x256xf32>
      %530 = arith.addf %524, %529 : vector<2x256xf32>
      %c0_245 = arith.constant 0 : index
      %c0_246 = arith.constant 0 : index
      %c114 = arith.constant 114 : index
      %531 = vector.load %arg6[%c0_245, %c0_246, %c114] : memref<2x2x512xf32, #tpu.memory_space<vmem>>, vector<1x2x256xf32>
      %532 = vector.shape_cast %531 : vector<1x2x256xf32> to vector<2x256xf32>
      %c19 = arith.constant 19 : index
      %533 = memref.load %arg3[%c19] : memref<98xf32, #tpu.memory_space<smem>>
      %534 = vector.broadcast %533 : f32 to vector<2x256xf32>
      %535 = arith.mulf %534, %532 : vector<2x256xf32>
      %536 = arith.addf %530, %535 : vector<2x256xf32>
      %c0_247 = arith.constant 0 : index
      %c0_248 = arith.constant 0 : index
      %c130 = arith.constant 130 : index
      %537 = vector.load %arg6[%c0_247, %c0_248, %c130] : memref<2x2x512xf32, #tpu.memory_space<vmem>>, vector<1x2x256xf32>
      %538 = vector.shape_cast %537 : vector<1x2x256xf32> to vector<2x256xf32>
      %c26 = arith.constant 26 : index
      %539 = memref.load %arg3[%c26] : memref<98xf32, #tpu.memory_space<smem>>
      %540 = vector.broadcast %539 : f32 to vector<2x256xf32>
      %541 = arith.mulf %540, %538 : vector<2x256xf32>
      %542 = arith.addf %536, %541 : vector<2x256xf32>
      %c0_249 = arith.constant 0 : index
      %c0_250 = arith.constant 0 : index
      %c146 = arith.constant 146 : index
      %543 = vector.load %arg6[%c0_249, %c0_250, %c146] : memref<2x2x512xf32, #tpu.memory_space<vmem>>, vector<1x2x256xf32>
      %544 = vector.shape_cast %543 : vector<1x2x256xf32> to vector<2x256xf32>
      %c33 = arith.constant 33 : index
      %545 = memref.load %arg3[%c33] : memref<98xf32, #tpu.memory_space<smem>>
      %546 = vector.broadcast %545 : f32 to vector<2x256xf32>
      %547 = arith.mulf %546, %544 : vector<2x256xf32>
      %548 = arith.addf %542, %547 : vector<2x256xf32>
      %c0_251 = arith.constant 0 : index
      %c0_252 = arith.constant 0 : index
      %c162 = arith.constant 162 : index
      %549 = vector.load %arg6[%c0_251, %c0_252, %c162] : memref<2x2x512xf32, #tpu.memory_space<vmem>>, vector<1x2x256xf32>
      %550 = vector.shape_cast %549 : vector<1x2x256xf32> to vector<2x256xf32>
      %c40 = arith.constant 40 : index
      %551 = memref.load %arg3[%c40] : memref<98xf32, #tpu.memory_space<smem>>
      %552 = vector.broadcast %551 : f32 to vector<2x256xf32>
      %553 = arith.mulf %552, %550 : vector<2x256xf32>
      %554 = arith.addf %548, %553 : vector<2x256xf32>
      %c0_253 = arith.constant 0 : index
      %c0_254 = arith.constant 0 : index
      %c178 = arith.constant 178 : index
      %555 = vector.load %arg6[%c0_253, %c0_254, %c178] : memref<2x2x512xf32, #tpu.memory_space<vmem>>, vector<1x2x256xf32>
      %556 = vector.shape_cast %555 : vector<1x2x256xf32> to vector<2x256xf32>
      %c47 = arith.constant 47 : index
      %557 = memref.load %arg3[%c47] : memref<98xf32, #tpu.memory_space<smem>>
      %558 = vector.broadcast %557 : f32 to vector<2x256xf32>
      %559 = arith.mulf %558, %556 : vector<2x256xf32>
      %560 = arith.addf %554, %559 : vector<2x256xf32>
      %c1_255 = arith.constant 1 : index
      %c0_256 = arith.constant 0 : index
      %c82_257 = arith.constant 82 : index
      %561 = vector.load %arg6[%c1_255, %c0_256, %c82_257] : memref<2x2x512xf32, #tpu.memory_space<vmem>>, vector<1x2x256xf32>
      %562 = vector.shape_cast %561 : vector<1x2x256xf32> to vector<2x256xf32>
      %c54 = arith.constant 54 : index
      %563 = memref.load %arg3[%c54] : memref<98xf32, #tpu.memory_space<smem>>
      %564 = vector.broadcast %563 : f32 to vector<2x256xf32>
      %565 = arith.mulf %564, %562 : vector<2x256xf32>
      %566 = arith.addf %560, %565 : vector<2x256xf32>
      %c1_258 = arith.constant 1 : index
      %c0_259 = arith.constant 0 : index
      %c98_260 = arith.constant 98 : index
      %567 = vector.load %arg6[%c1_258, %c0_259, %c98_260] : memref<2x2x512xf32, #tpu.memory_space<vmem>>, vector<1x2x256xf32>
      %568 = vector.shape_cast %567 : vector<1x2x256xf32> to vector<2x256xf32>
      %c61 = arith.constant 61 : index
      %569 = memref.load %arg3[%c61] : memref<98xf32, #tpu.memory_space<smem>>
      %570 = vector.broadcast %569 : f32 to vector<2x256xf32>
      %571 = arith.mulf %570, %568 : vector<2x256xf32>
      %572 = arith.addf %566, %571 : vector<2x256xf32>
      %c1_261 = arith.constant 1 : index
      %c0_262 = arith.constant 0 : index
      %c114_263 = arith.constant 114 : index
      %573 = vector.load %arg6[%c1_261, %c0_262, %c114_263] : memref<2x2x512xf32, #tpu.memory_space<vmem>>, vector<1x2x256xf32>
      %574 = vector.shape_cast %573 : vector<1x2x256xf32> to vector<2x256xf32>
      %c68 = arith.constant 68 : index
      %575 = memref.load %arg3[%c68] : memref<98xf32, #tpu.memory_space<smem>>
      %576 = vector.broadcast %575 : f32 to vector<2x256xf32>
      %577 = arith.mulf %576, %574 : vector<2x256xf32>
      %578 = arith.addf %572, %577 : vector<2x256xf32>
      %c1_264 = arith.constant 1 : index
      %c0_265 = arith.constant 0 : index
      %c130_266 = arith.constant 130 : index
      %579 = vector.load %arg6[%c1_264, %c0_265, %c130_266] : memref<2x2x512xf32, #tpu.memory_space<vmem>>, vector<1x2x256xf32>
      %580 = vector.shape_cast %579 : vector<1x2x256xf32> to vector<2x256xf32>
      %c75 = arith.constant 75 : index
      %581 = memref.load %arg3[%c75] : memref<98xf32, #tpu.memory_space<smem>>
      %582 = vector.broadcast %581 : f32 to vector<2x256xf32>
      %583 = arith.mulf %582, %580 : vector<2x256xf32>
      %584 = arith.addf %578, %583 : vector<2x256xf32>
      %c1_267 = arith.constant 1 : index
      %c0_268 = arith.constant 0 : index
      %c146_269 = arith.constant 146 : index
      %585 = vector.load %arg6[%c1_267, %c0_268, %c146_269] : memref<2x2x512xf32, #tpu.memory_space<vmem>>, vector<1x2x256xf32>
      %586 = vector.shape_cast %585 : vector<1x2x256xf32> to vector<2x256xf32>
      %c82_270 = arith.constant 82 : index
      %587 = memref.load %arg3[%c82_270] : memref<98xf32, #tpu.memory_space<smem>>
      %588 = vector.broadcast %587 : f32 to vector<2x256xf32>
      %589 = arith.mulf %588, %586 : vector<2x256xf32>
      %590 = arith.addf %584, %589 : vector<2x256xf32>
      %c1_271 = arith.constant 1 : index
      %c0_272 = arith.constant 0 : index
      %c162_273 = arith.constant 162 : index
      %591 = vector.load %arg6[%c1_271, %c0_272, %c162_273] : memref<2x2x512xf32, #tpu.memory_space<vmem>>, vector<1x2x256xf32>
      %592 = vector.shape_cast %591 : vector<1x2x256xf32> to vector<2x256xf32>
      %c89 = arith.constant 89 : index
      %593 = memref.load %arg3[%c89] : memref<98xf32, #tpu.memory_space<smem>>
      %594 = vector.broadcast %593 : f32 to vector<2x256xf32>
      %595 = arith.mulf %594, %592 : vector<2x256xf32>
      %596 = arith.addf %590, %595 : vector<2x256xf32>
      %c1_274 = arith.constant 1 : index
      %c0_275 = arith.constant 0 : index
      %c178_276 = arith.constant 178 : index
      %597 = vector.load %arg6[%c1_274, %c0_275, %c178_276] : memref<2x2x512xf32, #tpu.memory_space<vmem>>, vector<1x2x256xf32>
      %598 = vector.shape_cast %597 : vector<1x2x256xf32> to vector<2x256xf32>
      %c96_277 = arith.constant 96 : index
      %599 = memref.load %arg3[%c96_277] : memref<98xf32, #tpu.memory_space<smem>>
      %600 = vector.broadcast %599 : f32 to vector<2x256xf32>
      %601 = arith.mulf %600, %598 : vector<2x256xf32>
      %602 = arith.addf %596, %601 : vector<2x256xf32>
      %cst_278 = arith.constant 0.000000e+00 : f32
      %603 = vector.broadcast %cst_278 : f32 to vector<2x256xf32>
      %604 = arith.select %517, %602, %603 : vector<2x256xi1>, vector<2x256xf32>
      %605 = arith.addf %512, %604 : vector<2x256xf32>
      %c-3_i32 = arith.constant -3 : i32
      %606 = vector.broadcast %c-3_i32 : i32 to vector<2x256xi32>
      %607 = arith.cmpi sge, %45, %606 : vector<2x256xi32>
      %c13_i32 = arith.constant 13 : i32
      %608 = vector.broadcast %c13_i32 : i32 to vector<2x256xi32>
      %609 = arith.cmpi slt, %45, %608 : vector<2x256xi32>
      %610 = arith.andi %607, %609 : vector<2x256xi1>
      %cst_279 = arith.constant 0.000000e+00 : f32
      %611 = vector.broadcast %cst_279 : f32 to vector<2x256xf32>
      %c0_280 = arith.constant 0 : index
      %c0_281 = arith.constant 0 : index
      %c83 = arith.constant 83 : index
      %612 = vector.load %arg6[%c0_280, %c0_281, %c83] : memref<2x2x512xf32, #tpu.memory_space<vmem>>, vector<1x2x256xf32>
      %613 = vector.shape_cast %612 : vector<1x2x256xf32> to vector<2x256xf32>
      %c6 = arith.constant 6 : index
      %614 = memref.load %arg3[%c6] : memref<98xf32, #tpu.memory_space<smem>>
      %615 = vector.broadcast %614 : f32 to vector<2x256xf32>
      %616 = arith.mulf %615, %613 : vector<2x256xf32>
      %617 = arith.addf %611, %616 : vector<2x256xf32>
      %c0_282 = arith.constant 0 : index
      %c0_283 = arith.constant 0 : index
      %c99 = arith.constant 99 : index
      %618 = vector.load %arg6[%c0_282, %c0_283, %c99] : memref<2x2x512xf32, #tpu.memory_space<vmem>>, vector<1x2x256xf32>
      %619 = vector.shape_cast %618 : vector<1x2x256xf32> to vector<2x256xf32>
      %c13 = arith.constant 13 : index
      %620 = memref.load %arg3[%c13] : memref<98xf32, #tpu.memory_space<smem>>
      %621 = vector.broadcast %620 : f32 to vector<2x256xf32>
      %622 = arith.mulf %621, %619 : vector<2x256xf32>
      %623 = arith.addf %617, %622 : vector<2x256xf32>
      %c0_284 = arith.constant 0 : index
      %c0_285 = arith.constant 0 : index
      %c115 = arith.constant 115 : index
      %624 = vector.load %arg6[%c0_284, %c0_285, %c115] : memref<2x2x512xf32, #tpu.memory_space<vmem>>, vector<1x2x256xf32>
      %625 = vector.shape_cast %624 : vector<1x2x256xf32> to vector<2x256xf32>
      %c20 = arith.constant 20 : index
      %626 = memref.load %arg3[%c20] : memref<98xf32, #tpu.memory_space<smem>>
      %627 = vector.broadcast %626 : f32 to vector<2x256xf32>
      %628 = arith.mulf %627, %625 : vector<2x256xf32>
      %629 = arith.addf %623, %628 : vector<2x256xf32>
      %c0_286 = arith.constant 0 : index
      %c0_287 = arith.constant 0 : index
      %c131 = arith.constant 131 : index
      %630 = vector.load %arg6[%c0_286, %c0_287, %c131] : memref<2x2x512xf32, #tpu.memory_space<vmem>>, vector<1x2x256xf32>
      %631 = vector.shape_cast %630 : vector<1x2x256xf32> to vector<2x256xf32>
      %c27 = arith.constant 27 : index
      %632 = memref.load %arg3[%c27] : memref<98xf32, #tpu.memory_space<smem>>
      %633 = vector.broadcast %632 : f32 to vector<2x256xf32>
      %634 = arith.mulf %633, %631 : vector<2x256xf32>
      %635 = arith.addf %629, %634 : vector<2x256xf32>
      %c0_288 = arith.constant 0 : index
      %c0_289 = arith.constant 0 : index
      %c147 = arith.constant 147 : index
      %636 = vector.load %arg6[%c0_288, %c0_289, %c147] : memref<2x2x512xf32, #tpu.memory_space<vmem>>, vector<1x2x256xf32>
      %637 = vector.shape_cast %636 : vector<1x2x256xf32> to vector<2x256xf32>
      %c34 = arith.constant 34 : index
      %638 = memref.load %arg3[%c34] : memref<98xf32, #tpu.memory_space<smem>>
      %639 = vector.broadcast %638 : f32 to vector<2x256xf32>
      %640 = arith.mulf %639, %637 : vector<2x256xf32>
      %641 = arith.addf %635, %640 : vector<2x256xf32>
      %c0_290 = arith.constant 0 : index
      %c0_291 = arith.constant 0 : index
      %c163 = arith.constant 163 : index
      %642 = vector.load %arg6[%c0_290, %c0_291, %c163] : memref<2x2x512xf32, #tpu.memory_space<vmem>>, vector<1x2x256xf32>
      %643 = vector.shape_cast %642 : vector<1x2x256xf32> to vector<2x256xf32>
      %c41 = arith.constant 41 : index
      %644 = memref.load %arg3[%c41] : memref<98xf32, #tpu.memory_space<smem>>
      %645 = vector.broadcast %644 : f32 to vector<2x256xf32>
      %646 = arith.mulf %645, %643 : vector<2x256xf32>
      %647 = arith.addf %641, %646 : vector<2x256xf32>
      %c0_292 = arith.constant 0 : index
      %c0_293 = arith.constant 0 : index
      %c179 = arith.constant 179 : index
      %648 = vector.load %arg6[%c0_292, %c0_293, %c179] : memref<2x2x512xf32, #tpu.memory_space<vmem>>, vector<1x2x256xf32>
      %649 = vector.shape_cast %648 : vector<1x2x256xf32> to vector<2x256xf32>
      %c48 = arith.constant 48 : index
      %650 = memref.load %arg3[%c48] : memref<98xf32, #tpu.memory_space<smem>>
      %651 = vector.broadcast %650 : f32 to vector<2x256xf32>
      %652 = arith.mulf %651, %649 : vector<2x256xf32>
      %653 = arith.addf %647, %652 : vector<2x256xf32>
      %c1_294 = arith.constant 1 : index
      %c0_295 = arith.constant 0 : index
      %c83_296 = arith.constant 83 : index
      %654 = vector.load %arg6[%c1_294, %c0_295, %c83_296] : memref<2x2x512xf32, #tpu.memory_space<vmem>>, vector<1x2x256xf32>
      %655 = vector.shape_cast %654 : vector<1x2x256xf32> to vector<2x256xf32>
      %c55 = arith.constant 55 : index
      %656 = memref.load %arg3[%c55] : memref<98xf32, #tpu.memory_space<smem>>
      %657 = vector.broadcast %656 : f32 to vector<2x256xf32>
      %658 = arith.mulf %657, %655 : vector<2x256xf32>
      %659 = arith.addf %653, %658 : vector<2x256xf32>
      %c1_297 = arith.constant 1 : index
      %c0_298 = arith.constant 0 : index
      %c99_299 = arith.constant 99 : index
      %660 = vector.load %arg6[%c1_297, %c0_298, %c99_299] : memref<2x2x512xf32, #tpu.memory_space<vmem>>, vector<1x2x256xf32>
      %661 = vector.shape_cast %660 : vector<1x2x256xf32> to vector<2x256xf32>
      %c62 = arith.constant 62 : index
      %662 = memref.load %arg3[%c62] : memref<98xf32, #tpu.memory_space<smem>>
      %663 = vector.broadcast %662 : f32 to vector<2x256xf32>
      %664 = arith.mulf %663, %661 : vector<2x256xf32>
      %665 = arith.addf %659, %664 : vector<2x256xf32>
      %c1_300 = arith.constant 1 : index
      %c0_301 = arith.constant 0 : index
      %c115_302 = arith.constant 115 : index
      %666 = vector.load %arg6[%c1_300, %c0_301, %c115_302] : memref<2x2x512xf32, #tpu.memory_space<vmem>>, vector<1x2x256xf32>
      %667 = vector.shape_cast %666 : vector<1x2x256xf32> to vector<2x256xf32>
      %c69 = arith.constant 69 : index
      %668 = memref.load %arg3[%c69] : memref<98xf32, #tpu.memory_space<smem>>
      %669 = vector.broadcast %668 : f32 to vector<2x256xf32>
      %670 = arith.mulf %669, %667 : vector<2x256xf32>
      %671 = arith.addf %665, %670 : vector<2x256xf32>
      %c1_303 = arith.constant 1 : index
      %c0_304 = arith.constant 0 : index
      %c131_305 = arith.constant 131 : index
      %672 = vector.load %arg6[%c1_303, %c0_304, %c131_305] : memref<2x2x512xf32, #tpu.memory_space<vmem>>, vector<1x2x256xf32>
      %673 = vector.shape_cast %672 : vector<1x2x256xf32> to vector<2x256xf32>
      %c76 = arith.constant 76 : index
      %674 = memref.load %arg3[%c76] : memref<98xf32, #tpu.memory_space<smem>>
      %675 = vector.broadcast %674 : f32 to vector<2x256xf32>
      %676 = arith.mulf %675, %673 : vector<2x256xf32>
      %677 = arith.addf %671, %676 : vector<2x256xf32>
      %c1_306 = arith.constant 1 : index
      %c0_307 = arith.constant 0 : index
      %c147_308 = arith.constant 147 : index
      %678 = vector.load %arg6[%c1_306, %c0_307, %c147_308] : memref<2x2x512xf32, #tpu.memory_space<vmem>>, vector<1x2x256xf32>
      %679 = vector.shape_cast %678 : vector<1x2x256xf32> to vector<2x256xf32>
      %c83_309 = arith.constant 83 : index
      %680 = memref.load %arg3[%c83_309] : memref<98xf32, #tpu.memory_space<smem>>
      %681 = vector.broadcast %680 : f32 to vector<2x256xf32>
      %682 = arith.mulf %681, %679 : vector<2x256xf32>
      %683 = arith.addf %677, %682 : vector<2x256xf32>
      %c1_310 = arith.constant 1 : index
      %c0_311 = arith.constant 0 : index
      %c163_312 = arith.constant 163 : index
      %684 = vector.load %arg6[%c1_310, %c0_311, %c163_312] : memref<2x2x512xf32, #tpu.memory_space<vmem>>, vector<1x2x256xf32>
      %685 = vector.shape_cast %684 : vector<1x2x256xf32> to vector<2x256xf32>
      %c90 = arith.constant 90 : index
      %686 = memref.load %arg3[%c90] : memref<98xf32, #tpu.memory_space<smem>>
      %687 = vector.broadcast %686 : f32 to vector<2x256xf32>
      %688 = arith.mulf %687, %685 : vector<2x256xf32>
      %689 = arith.addf %683, %688 : vector<2x256xf32>
      %c1_313 = arith.constant 1 : index
      %c0_314 = arith.constant 0 : index
      %c179_315 = arith.constant 179 : index
      %690 = vector.load %arg6[%c1_313, %c0_314, %c179_315] : memref<2x2x512xf32, #tpu.memory_space<vmem>>, vector<1x2x256xf32>
      %691 = vector.shape_cast %690 : vector<1x2x256xf32> to vector<2x256xf32>
      %c97_316 = arith.constant 97 : index
      %692 = memref.load %arg3[%c97_316] : memref<98xf32, #tpu.memory_space<smem>>
      %693 = vector.broadcast %692 : f32 to vector<2x256xf32>
      %694 = arith.mulf %693, %691 : vector<2x256xf32>
      %695 = arith.addf %689, %694 : vector<2x256xf32>
      %cst_317 = arith.constant 0.000000e+00 : f32
      %696 = vector.broadcast %cst_317 : f32 to vector<2x256xf32>
      %697 = arith.select %610, %695, %696 : vector<2x256xi1>, vector<2x256xf32>
      %698 = arith.addf %605, %697 : vector<2x256xf32>
      %699 = arith.negf %698 : vector<2x256xf32>
      %700 = math.exp %699 : vector<2x256xf32>
      %cst_318 = arith.constant 1.000000e+00 : f32
      %701 = vector.broadcast %cst_318 : f32 to vector<2x256xf32>
      %702 = arith.addf %701, %700 : vector<2x256xf32>
      %703 = arith.divf %701, %702 : vector<2x256xf32>
      %c0_319 = arith.constant 0 : index
      %c0_320 = arith.constant 0 : index
      %c0_321 = arith.constant 0 : index
      %704 = vector.load %arg5[%c0_319, %c0_320, %c0_321] : memref<1x2x256xf32, #tpu.memory_space<vmem>>, vector<1x2x256xf32>
      %705 = vector.shape_cast %704 : vector<1x2x256xf32> to vector<2x256xf32>
      %706 = vector.shape_cast %703 : vector<2x256xf32> to vector<1x2x256xf32>
      tpu.vector_store %arg5[%c0_319, %c0_320, %c0_321], %706 {strides = array<i32>} : memref<1x2x256xf32, #tpu.memory_space<vmem>>, vector<1x2x256xf32>,
    } else {
    }
    return
  }
  func.func @transform_0(%arg0: i32, %arg1: i32) -> (i32, i32, i32) {
    %c0_i32 = arith.constant 0 : i32
    %c0_i32_0 = arith.constant 0 : i32
    return %arg0, %arg1, %c0_i32 : i32, i32, i32
  }
  func.func @transform_1(%arg0: i32, %arg1: i32) -> i32 {
    %c0_i32 = arith.constant 0 : i32
    %c0_i32_0 = arith.constant 0 : i32
    return %c0_i32 : i32
  }
  func.func @transform_2(%arg0: i32, %arg1: i32) -> i32 {
    %c0_i32 = arith.constant 0 : i32
    %c0_i32_0 = arith.constant 0 : i32
    return %c0_i32 : i32
  }
  func.func @transform_3(%arg0: i32, %arg1: i32) -> (i32, i32, i32) {
    %c0_i32 = arith.constant 0 : i32
    %c0_i32_0 = arith.constant 0 : i32
    %c0_i32_1 = arith.constant 0 : i32
    return %arg0, %c0_i32, %c0_i32_0 : i32, i32, i32
  }
}

</mosaic_0001>

<bundles_post_ra>
// kernel: tpu_custom_call.1
= control target key start
LH: loop header
LB: loop body
LE: loop exit
PB: predicated region body
PF: predicated region fallthrough
CT: control target
= control target key end

     0   :  { %9 = vsyncpa [#allocation7], 0  ;;  %s2329_s0 = inlined_call_operand.hbm [shape: f32[2,4,256], index: 0, kind: input, shape index: {}]   ;;  %s2330_s1 = inlined_call_operand.vmem [shape: f32[98], index: 1, kind: input, shape index: {}]   ;;  %s2331_s2 = inlined_call_operand.<no memory space> [shape: f32[1], index: 2, kind: input, shape index: {}]   ;;  %s2332_s3 = inlined_call_operand.hbm [shape: f32[1,2,256], index: 3, kind: output, shape index: {}]  }
   0x1   :  { %10 = vsyncpa [#allocation9], 0 }
   0x2   :  { %11 = vsyncpa [#allocation8], 0  ;;  %s1677_s12 = smov [#allocation6]   ;;  %s30_s16 = sshll.u32 %s2330_s1, 4  ;;  %s31_s16 = int_to_ptr.vmem [resolvable:$true] %s30_s16 }
   0x3   :  { %s17_s13 = sshll.u32 %s1677_s12, 4  ;;  %s1615_s19 = scalar_lea.hbm %s2329_s0, 256  ;;  %s18_s13 = int_to_ptr.vmem [resolvable:$true] %s17_s13 }
   0x4   :  { %p1616_p0 = scmp.ne.s32.totalorder %s2329_s0, %s1615_s19  ;;  %p1619_p1 = scmp.lt.u32.totalorder %s1615_s19, %s2329_s0 }
   0x6   :  { %p1621_p2 = pnand %p1619_p1, %p1616_p0 }
   0x8   :  { %1624 = shalt.err (!%p1621_p2)
}
   0x9   :  { %s1625_s24 = scalar_lea.vmem %s18_s13, 256  ;;  %p1630_p4 = scmp.lt.s32.totalorder %s18_s13, %s18_s13 }
   0xa   :  { %p1626_p3 = scmp.ne.s32.totalorder %s18_s13, %s1625_s24  ;;  %p1631_p5 = scmp.lt.s32.totalorder %s1625_s24, %s1625_s24 }
   0xc   :  { %p1632_p6 = por %p1631_p5, %p1630_p4 }
   0xe   :  { %p1633_p7 = pnand %p1632_p6, %p1626_p3 }
  0x10   :  { %1636 = shalt.err (!%p1633_p7)
}
  0x11   :  { %s1678_s1 = smov 128   ;;  %s1679_s25 = smov 8  }
  0x12   :  { %23 = dma.hbm_to_vmem [thread:$0]  %s2329_s0, 256, %s18_s13, [#allocation7], %s1678_s1, %s1678_s1, %s1679_s25  }
  0x13   :  { %s1637_s28 = scalar_lea.vmem %s31_s16, 16  ;;  %p1642_p9 = scmp.lt.s32.totalorder %s31_s16, %s31_s16 }
  0x14   :  { %p1638_p8 = scmp.ne.s32.totalorder %s31_s16, %s1637_s28  ;;  %p1643_p10 = scmp.lt.s32.totalorder %s1637_s28, %s1637_s28 }
  0x16   :  { %p1644_p11 = por %p1643_p10, %p1642_p9 }
  0x18   :  { %p1645_p12 = pnand %p1644_p11, %p1638_p8 }
  0x1a   :  { %1648 = shalt.err (!%p1645_p12)
}
  0x1b   :  { %s1680_s29 = smov [#allocation10]  }
  0x1c   :  { %33 = dma.vmem_to_smem %s31_s16, 16, %s1680_s29, [#allocation9]  }
  0x1d   :  { %1671 = dma.done.wait [#allocation7], 256  }
  0x1e   :  { %1672 = vsyncadd [#allocation7], 4294967040 }
  0x1f   :  { %1673 = dma.done.wait [#allocation9], 16  }
  0x20   :  { %1674 = vsyncadd [#allocation9], 4294967280 }
  0x21   :  { %42 = sfence }
  0x22   :  { %v1681_v0 = vmov -inf   ;;  %v1682_v1 = vmov 0.0   ;;  %v55_v2 = vld [vmem:[#allocation6] sm:$0xff]  ;;  %v56_v3 = vld [vmem:[#allocation6 + $0x8] sm:$0xff]  ;;  %v1683_v22 = vmov 1983009808   ;;  %v162_v24 = vlaneseq }
  0x23   :  { %51 = vst [vmem:[#allocation4] sm:$0xff] %v1681_v0  ;;  %52 = vst [vmem:[#allocation4 + $0x8] sm:$0xff] %v1681_v0  ;;  %v63_v4 = vcombine.high %v55_v2, %v55_v2  ;;  %v64_v5 = vcombine.high %v56_v3, %v56_v3  ;;  %v160_v23 = vunpack.c.l.s4 %v1683_v22  ;;  %vm179_vm0 = vcmask 1041409   ;;  %s1493_s0 = sld [smem:[#allocation10 + $0x3f]]  ;;  %s1492_s30 = sld [smem:[#allocation10 + $0x38]] }
  0x24   :  { %53 = vst [vmem:[#allocation4 + $0x10] sm:$0xff] %v1681_v0  ;;  %54 = vst [vmem:[#allocation4 + $0x18] sm:$0xff] %v1681_v0  ;;  %v163_v26 = vshrl.u32 %v162_v24, 7  ;;  %vm181_vm1 = vcmask 1043459   ;;  %vm183_vm2 = vcmask 1045509   ;;  %vm185_vm3 = vcmask 1047559  }
  0x25   :  { %151 = vst [vmem:[#allocation2 + $0x8] sm:$0x3] %v1682_v1  ;;  %47 = vst [vmem:[#allocation3] sm:$0xff] %v1682_v1  ;;  %v161_v25 = vunpack.c.0.s8 %v160_v23  ;;  %s1494_s4 = sld [smem:[#allocation10 + $0x46]]  ;;  %s1487_s5 = sld [smem:[#allocation10 + $0x15]]  ;;  %vm266_vm4 = vcmask 916480  }
  0x26   :  { %48 = vst [vmem:[#allocation3 + $0x8] sm:$0xff] %v1682_v1  ;;  %49 = vst [vmem:[#allocation3 + $0x10] sm:$0xff] %v1682_v1  ;;  %s1488_s6 = sld [smem:[#allocation10 + $0x1c]]  ;;  %s1485_s7 = sld [smem:[#allocation10 + $0x7]]  ;;  %vm277_vm5 = vcmask 785408   ;;  %vm288_vm6 = vcmask 654336  }
  0x27   :  { %50 = vst [vmem:[#allocation3 + $0x18] sm:$0xff] %v1682_v1  ;;  %150 = vst [vmem:[#allocation2] sm:$0x3] %v1682_v1  ;;  %v1733_v37 = vsub.s32 %v161_v25, %v163_v26  ;;  %s1490_s8 = sld [smem:[#allocation10 + $0x2a]]  ;;  %s1486_s9 = sld [smem:[#allocation10 + $0xe]]  ;;  %vm300_vm7 = vcmask 523264  }
  0x28   :  { %152 = vst [vmem:[#allocation2 + $0x6] sm:$0x3] %v1682_v1  ;;  %153 = vst [vmem:[#allocation2 + $0xe] sm:$0x3] %v1682_v1  ;;  %s1684_s10 = smov 96   ;;  %s1685_s11 = smov 112  }
  0x29   :  { %s1499_s12 = sld [smem:[#allocation10 + $0x8]]  ;;  %s1489_s13 = sld [smem:[#allocation10 + $0x23]]  ;;  %vm311_vm8 = vcmask 392192   ;;  %vm322_vm9 = vcmask 261120   ;;  %vm415_vm10 = vcmask 416768   ;;  %vm585_vm12 = vcmask 408576  }
  0x2a   :  { %v75_v6 = vld [vmem:[#allocation4] sm:$0xf]  ;;  %v76_v7 = vld [vmem:[#allocation4 + $0x8] sm:$0xf]  ;;  %s1686_s14 = smov 80   ;;  %s1513_s15 = sld [smem:[#allocation10 + $0x9]] }
  0x2b   :  { %v77_v8 = vld [vmem:[#allocation4 + $0x10] sm:$0xf]  ;;  %v78_v9 = vld [vmem:[#allocation4 + $0x18] sm:$0xf]  ;;  %v79_v10 = vmax.f32 %v75_v6, %v55_v2  ;;  %v80_v11 = vmax.f32 %v76_v7, %v63_v4  ;;  %s1500_s16 = sld [smem:[#allocation10 + $0xf]]  ;;  %s1687_s17 = smov 64  }
  0x2c   :  { %v81_v12 = vmax.f32 %v77_v8, %v56_v3  ;;  %v57_v13 = vld [vmem:[#allocation3] sm:$0xf]  ;;  %v82_v15 = vmax.f32 %v78_v9, %v64_v5  ;;  %s1514_s18 = sld [smem:[#allocation10 + $0x10]]  ;;  %s1501_s19 = sld [smem:[#allocation10 + $0x16]]  ;;  %vm755_vm13 = vcmask 400384  }
  0x2d   :  { %v58_v14 = vld [vmem:[#allocation3 + $0x8] sm:$0xf]  ;;  %v59_v16 = vld [vmem:[#allocation3 + $0x10] sm:$0xf]  ;;  %v67_v18 = vadd.f32 %v57_v13, %v55_v2  ;;  %83 = vst [vmem:[#allocation4] sm:$0xf] %v79_v10 }
  0x2e   :  { %v60_v17 = vld [vmem:[#allocation3 + $0x18] sm:$0xf]  ;;  %v68_v19 = vadd.f32 %v63_v4, %v58_v14  ;;  %84 = vst [vmem:[#allocation4 + $0x8] sm:$0xf] %v80_v11  ;;  %85 = vst [vmem:[#allocation4 + $0x10] sm:$0xf] %v81_v12  ;;  %v69_v20 = vadd.f32 %v59_v16, %v56_v3 }
  0x2f   :  { %v70_v21 = vadd.f32 %v64_v5, %v60_v17  ;;  %86 = vst [vmem:[#allocation4 + $0x18] sm:$0xf] %v82_v15  ;;  %71 = vst [vmem:[#allocation3] sm:$0xf] %v67_v18  ;;  %s1688_s20 = smov 32   ;;  %s1502_s21 = sld [smem:[#allocation10 + $0x1d]] }
  0x30   :  { %72 = vst [vmem:[#allocation3 + $0x8] sm:$0xf] %v68_v19  ;;  %73 = vst [vmem:[#allocation3 + $0x10] sm:$0xf] %v69_v20  ;;  %s1527_s22 = sld [smem:[#allocation10 + $0xa]]  ;;  %s1689_s23 = smov 48  }
  0x31   :  { %74 = vst [vmem:[#allocation3 + $0x18] sm:$0xf] %v70_v21  ;;  %s1541_s24 = sld [smem:[#allocation10 + $0xb]]  ;;  %s1515_s1 = sld [smem:[#allocation10 + $0x17]] }
  0x32   :  { %s1503_s25 = sld [smem:[#allocation10 + $0x24]]  ;;  %s1528_s26 = sld [smem:[#allocation10 + $0x11]] }
  0x33   :  { %s1542_s27 = sld [smem:[#allocation10 + $0x12]]  ;;  %s1516_s28 = sld [smem:[#allocation10 + $0x1e]] }
  0x34   :  { %v122_v27 = vld [vmem:[#allocation4] sm:$0xff]  ;;  %s1529_s29 = sld [smem:[#allocation10 + $0x18]] }
  0x35   :  { %v123_v28 = vld [vmem:[#allocation4 + $0x8] sm:$0xff]  ;;  %v124_v29 = vld [vmem:[#allocation4 + $0x10] sm:$0xff]  ;;  %v126_v31 = vrot.slane %v122_v27, 4 }
  0x36   :  { %v125_v30 = vld [vmem:[#allocation4 + $0x18] sm:$0xff]  ;;  %v132_v32 = vrot.slane %v123_v28, 4  ;;  %v138_v33 = vrot.slane %v124_v29, 4  ;;  %v90_v34 = vld [vmem:[#allocation3] sm:$0xff] }
  0x37   :  { %v91_v35 = vld [vmem:[#allocation3 + $0x8] sm:$0xff]  ;;  %v144_v36 = vrot.slane %v125_v30, 4  ;;  %v92_v38 = vld [vmem:[#allocation3 + $0x10] sm:$0xff]  ;;  %v94_v40 = vrot.slane %v90_v34, 4  ;;  %v127_v42 = vmax.f32 %v122_v27, %v126_v31 }
  0x38   :  { %v93_v39 = vld [vmem:[#allocation3 + $0x18] sm:$0xff]  ;;  %v100_v41 = vrot.slane %v91_v35, 4  ;;  %v133_v43 = vmax.f32 %v123_v28, %v132_v32  ;;  %v139_v44 = vmax.f32 %v124_v29, %v138_v33  ;;  %v106_v45 = vrot.slane %v92_v38, 4 }
  0x39   :  { %v145_v46 = vmax.f32 %v125_v30, %v144_v36  ;;  %v95_v47 = vadd.f32 %v94_v40, %v90_v34  ;;  %v112_v49 = vrot.slane %v93_v39, 4  ;;  %v128_v50 = vrot.slane %v127_v42, 2 }
  0x3a   :  { %v101_v48 = vadd.f32 %v100_v41, %v91_v35  ;;  %v134_v51 = vrot.slane %v133_v43, 2  ;;  %v140_v52 = vrot.slane %v139_v44, 2  ;;  %v107_v53 = vadd.f32 %v106_v45, %v92_v38 }
  0x3b   :  { %v146_v54 = vrot.slane %v145_v46, 2  ;;  %v96_v55 = vrot.slane %v95_v47, 2  ;;  %v113_v57 = vadd.f32 %v112_v49, %v93_v39  ;;  %v129_v58 = vmax.f32 %v127_v42, %v128_v50 }
  0x3c   :  { %v102_v56 = vrot.slane %v101_v48, 2  ;;  %v135_v59 = vmax.f32 %v133_v43, %v134_v51  ;;  %v141_v60 = vmax.f32 %v139_v44, %v140_v52  ;;  %v108_v61 = vrot.slane %v107_v53, 2 }
  0x3d   :  { %v147_v62 = vmax.f32 %v145_v46, %v146_v54  ;;  %v97_v63 = vadd.f32 %v96_v55, %v95_v47  ;;  %v114_v1 = vrot.slane %v113_v57, 2  ;;  %v130_v2 = vrot.slane %v129_v58, 1 }
  0x3e   :  { %v103_v0 = vadd.f32 %v102_v56, %v101_v48  ;;  %v136_v3 = vrot.slane %v135_v59, 1  ;;  %v142_v4 = vrot.slane %v141_v60, 1  ;;  %v109_v5 = vadd.f32 %v108_v61, %v107_v53 }
  0x3f   :  { %v148_v6 = vrot.slane %v147_v62, 1  ;;  %v98_v7 = vrot.slane %v97_v63, 1  ;;  %v115_v9 = vadd.f32 %v114_v1, %v113_v57  ;;  %v131_v10 = vmax.f32 %v129_v58, %v130_v2 }
  0x40   :  { %v104_v8 = vrot.slane %v103_v0, 1  ;;  %v137_v11 = vmax.f32 %v135_v59, %v136_v3  ;;  %v143_v12 = vmax.f32 %v141_v60, %v142_v4  ;;  %v110_v13 = vrot.slane %v109_v5, 1 }
  0x41   :  { %v149_v14 = vmax.f32 %v147_v62, %v148_v6  ;;  %v99_v15 = vadd.f32 %v98_v7, %v97_v63  ;;  %v116_v17 = vrot.slane %v115_v9, 1  ;;  %v342_v44 = vstv %s1493_s0  ;;  %s1555_s0 = sld [smem:[#allocation10 + $0xc]] }
  0x42   :  { %v105_v16 = vadd.f32 %v104_v8, %v103_v0  ;;  %v193_v18 = vcombine.low %v131_v10, %v137_v11  ;;  %v111_v19 = vadd.f32 %v110_v13, %v109_v5  ;;  %v332_v45 = vstv %s1492_s30  ;;  %s1517_s30 = sld [smem:[#allocation10 + $0x25]] }
  0x43   :  { %v201_v20 = vcombine.low %v143_v12, %v149_v14  ;;  %v117_v21 = vadd.f32 %v116_v17, %v115_v9  ;;  %v118_v22 = vmul.f32 0.25, %v99_v15  ;;  %v352_v47 = vstv %s1494_s4  ;;  %s1504_s4 = sld [smem:[#allocation10 + $0x2b]] }
  0x44   :  { %v119_v23 = vmul.f32 0.25, %v105_v16  ;;  %v120_v25 = vmul.f32 0.25, %v111_v19  ;;  %v200_v26 = vrot.slane %v193_v18, %v1733_v37  ;;  %v282_v50 = vstv %s1487_s5  ;;  %s1556_s5 = sld [smem:[#allocation10 + $0x13]] }
  0x45   :  { %v208_v27 = vrot.slane %v201_v20, %v1733_v37  ;;  %v121_v28 = vmul.f32 0.25, %v117_v21  ;;  %v294_v54 = vstv %s1488_s6  ;;  %v260_v55 = vstv %s1485_s7  ;;  %s1543_s6 = sld [smem:[#allocation10 + $0x19]]  ;;  %s1530_s7 = sld [smem:[#allocation10 + $0x1f]] }
  0x46   :  { %v158_v29 = vcombine.low %v118_v22, %v119_v23  ;;  %v316_v59 = vstv %s1490_s8  ;;  %v271_v60 = vstv %s1486_s9  ;;  %v436_v0 = vstv %s1499_s12  ;;  %s1569_s8 = sld [smem:[#allocation10 + $0xd]]  ;;  %s1544_s9 = sld [smem:[#allocation10 + $0x20]] }
  0x47   :  { %v211_v30 = vrot.slane %v208_v27, 7  ;;  %v166_v31 = vcombine.low %v120_v25, %v121_v28  ;;  %v305_v1 = vstv %s1489_s13  ;;  %v606_v5 = vstv %s1513_s15  ;;  %s1518_s12 = sld [smem:[#allocation10 + $0x2c]]  ;;  %s1557_s15 = sld [smem:[#allocation10 + $0x1a]] }
  0x48   :  { %v165_v33 = vrot.slane %v158_v29, %v1733_v37  ;;  %v446_v6 = vstv %s1500_s16  ;;  %v616_v9 = vstv %s1514_s18  ;;  %v456_v10 = vstv %s1501_s19  ;;  %s1570_s13 = sld [smem:[#allocation10 + $0x14]]  ;;  %s1506_s16 = sld [smem:[#allocation10 + $0x39]] }
  0x49   :  { %v212_v32 = vsel %vm179_vm0, %v211_v30, %v200_v26  ;;  %v173_v34 = vrot.slane %v166_v31, %v1733_v37  ;;  %v467_v14 = vstv %s1502_s21  ;;  %v776_v16 = vstv %s1527_s22  ;;  %s1531_s18 = sld [smem:[#allocation10 + $0x26]]  ;;  %s1558_s19 = sld [smem:[#allocation10 + $0x21]] }
  0x4a   :  { %v213_v35 = vsel %vm181_vm1, %v211_v30, %v212_v32  ;;  %v947_v20 = vstv %s1541_s24  ;;  %v626_v21 = vstv %s1515_s1  ;;  %v477_v25 = vstv %s1503_s25  ;;  %s1545_s21 = sld [smem:[#allocation10 + $0x27]]  ;;  %s1532_s22 = sld [smem:[#allocation10 + $0x2d]] }
  0x4b   :  { %v214_v36 = vsel %vm183_vm2, %v211_v30, %v213_v35  ;;  %v178_v38 = vrot.slane %v173_v34, 7  ;;  %v786_v26 = vstv %s1528_s26  ;;  %v957_v29 = vstv %s1542_s27  ;;  %s1571_s24 = sld [smem:[#allocation10 + $0x1b]]  ;;  %s1520_s1 = sld [smem:[#allocation10 + $0x3a]] }
  0x4c   :  { %v215_v39 = vsel %vm185_vm3, %v211_v30, %v214_v36  ;;  %v637_v31 = vstv %s1516_s28  ;;  %v797_v35 = vstv %s1529_s29  ;;  %s1507_s25 = sld [smem:[#allocation10 + $0x40]]  ;;  %s1546_s27 = sld [smem:[#allocation10 + $0x2e]] }
  0x4d   :  { %218 = vst [vmem:[#allocation2 + $0xa] sm:$0xf] %v215_v39  ;;  %v180_v40 = vsel %vm179_vm0, %v178_v38, %v165_v33  ;;  %s1559_s26 = sld [smem:[#allocation10 + $0x28]]  ;;  %s1495_s28 = sld [smem:[#allocation10 + $0x4d]] }
  0x4e   :  { %v182_v41 = vsel %vm181_vm1, %v178_v38, %v180_v40  ;;  %s1572_s29 = sld [smem:[#allocation10 + $0x22]] }
  0x4f   :  { %v184_v42 = vsel %vm183_vm2, %v178_v38, %v182_v41  ;;  %v647_v41 = vstv %s1517_s30  ;;  %s1508_s30 = sld [smem:[#allocation10 + $0x47]] }
  0x50   :  { %v186_v43 = vsel %vm185_vm3, %v178_v38, %v184_v42  ;;  %v1117_v38 = vstv %s1555_s0  ;;  %v487_v42 = vstv %s1504_s4  ;;  %s1521_s0 = sld [smem:[#allocation10 + $0x41]]  ;;  %vm1096_vm3 = vcmask 384000  }
  0x51   :  { %188 = vst [vmem:[#allocation2 + $0x2] sm:$0xf] %v186_v43  ;;  %s1573_s4 = sld [smem:[#allocation10 + $0x29]] }
  0x54   :  { %v1747_v46 = vld [vmem:[#allocation2 + $0x8] sm:$0x3f] }
  0x55   :  { %v343_v48 = vmul.f32 %v342_v44, %v1747_v46  ;;  %v333_v49 = vmul.f32 %v332_v45, %v1747_v46  ;;  %v353_v51 = vmul.f32 %v352_v47, %v1747_v46  ;;  %v1127_v45 = vstv %s1556_s5  ;;  %s1560_s5 = sld [smem:[#allocation10 + $0x2f]] }
  0x57   :  { %345 = vrot.lane.b32.xlu1 %v343_v48, %s1684_s10  ;;  %335 = vrot.lane.b32.xlu0 %v333_v49, %s1685_s11  ;;  %v968_v48 = vstv %s1543_s6  ;;  %s1496_s6 = sld [smem:[#allocation10 + $0x54]] }
  0x58   :  { %v1754_v52 = vld [vmem:[#allocation2] sm:$0x3f] }
  0x59   :  { %v292_v53 = vld [vmem:[#allocation2 + $0x2] sm:$0x3f]  ;;  %v283_v56 = vmul.f32 %v282_v50, %v1754_v52  ;;  %v261_v58 = vmul.f32 %v260_v55, %v1754_v52  ;;  %v272_v62 = vmul.f32 %v271_v60, %v1754_v52  ;;  %v1287_v55 = vstv %s1569_s8  ;;  %s1522_s8 = sld [smem:[#allocation10 + $0x48]] }
  0x5a   :  { %v295_v57 = vmul.f32 %v294_v54, %v292_v53  ;;  %v317_v61 = vmul.f32 %v316_v59, %v292_v53  ;;  %v1763_v63 = vld [vmem:[#allocation2] sm:$0x3f]  ;;  %v306_v3 = vmul.f32 %v305_v1, %v292_v53  ;;  %v808_v53 = vstv %s1530_s7  ;;  %s1534_s7 = sld [smem:[#allocation10 + $0x3b]] }
  0x5b   :  { %355 = vrot.lane.b32.xlu0 %v353_v51, %s1686_s14  ;;  %285 = vrot.lane.b32.xlu1 %v283_v56, %s1686_s14  ;;  %v437_v2 = vmul.f32 %v436_v0, %v1763_v63  ;;  %v1768_v4 = vld [vmem:[#allocation2] sm:$0x3f]  ;;  %v447_v8 = vmul.f32 %v446_v6, %v1763_v63  ;;  %v457_v12 = vmul.f32 %v456_v10, %v1763_v63  ;;  %v657_v59 = vstv %s1518_s12  ;;  %s1574_s12 = sld [smem:[#allocation10 + $0x30]] }
  0x5c   :  { %v607_v7 = vmul.f32 %v606_v5, %v1768_v4  ;;  %v617_v11 = vmul.f32 %v616_v9, %v1768_v4  ;;  %v465_v13 = vld [vmem:[#allocation2 + $0x2] sm:$0x3f]  ;;  %v627_v23 = vmul.f32 %v626_v21, %v1768_v4  ;;  %v1138_v1 = vstv %s1557_s15  ;;  %v1822_v5 = vld [vmem:[#allocation2 + $0x8] sm:$0x3f]  ;;  %s1497_s15 = sld [smem:[#allocation10 + $0x5b]] }
  0x5d   :  { %v1778_v15 = vld [vmem:[#allocation2] sm:$0x3f]  ;;  %v468_v17 = vmul.f32 %v467_v14, %v465_v13  ;;  %v478_v27 = vmul.f32 %v477_v25, %v465_v13  ;;  %v488_v44 = vmul.f32 %v487_v42, %v465_v13  ;;  %v502_v6 = vstv %s1506_s16  ;;  %v1836_v21 = vld [vmem:[#allocation2 + $0x8] sm:$0x3f]  ;;  %s1535_s16 = sld [smem:[#allocation10 + $0x42]] }
  0x5e   :  { %v777_v18 = vmul.f32 %v776_v16, %v1778_v15  ;;  %v1783_v19 = vld [vmem:[#allocation2] sm:$0x3f]  ;;  %v787_v28 = vmul.f32 %v786_v26, %v1778_v15  ;;  %v1148_v10 = vstv %s1558_s19  ;;  %v828_v14 = vstv %s1532_s22  ;;  %s1510_s19 = sld [smem:[#allocation10 + $0x55]]  ;;  %s1549_s22 = sld [smem:[#allocation10 + $0x43]] }
  0x5f   :  { %297 = vrot.lane.b32.xlu1 %v295_v57, %s1687_s17  ;;  %263 = vrot.lane.b32.xlu0 %v261_v58, %s1685_s11  ;;  %v948_v22 = vmul.f32 %v947_v20, %v1783_v19  ;;  %v635_v30 = vld [vmem:[#allocation2 + $0x2] sm:$0x3f]  ;;  %v958_v32 = vmul.f32 %v957_v29, %v1783_v19  ;;  %v978_v58 = vstv %s1544_s9  ;;  %v1328_v42 = vstv %s1573_s4  ;;  %s1509_s9 = sld [smem:[#allocation10 + $0x4e]]  ;;  %s1912_s4 = sld [smem:[#allocation10 + $0x50]] }
  0x60   :  { %v638_v33 = vmul.f32 %v637_v31, %v635_v30  ;;  %v795_v34 = vld [vmem:[#allocation2 + $0x2] sm:$0xf]  ;;  %v648_v43 = vmul.f32 %v647_v41, %v635_v30  ;;  %v361_v31 = vld [vmem:[#allocation2 + $0xa] sm:$0x3f] }
  0x61   :  { %v1795_v36 = vld [vmem:[#allocation2] sm:$0x3f]  ;;  %v798_v39 = vmul.f32 %v797_v35, %v795_v34 }
  0x62   :  { %v1118_v40 = vmul.f32 %v1117_v38, %v1795_v36  ;;  %v1802_v47 = vld [vmem:[#allocation2 + $0x2] sm:$0x3f]  ;;  %v1128_v49 = vmul.f32 %v1127_v45, %v1795_v36  ;;  %v682_v38 = vstv %s1521_s0  ;;  %s1901_s0 = sld [smem:[#allocation10 + $0x1]] }
  0x63   :  { %319 = vrot.lane.b32.xlu1 %v317_v61, %s1688_s20  ;;  %274 = vrot.lane.b32.xlu0 %v272_v62, %s1684_s10  ;;  %v969_v50 = vmul.f32 %v968_v48, %v1802_v47  ;;  %v806_v51 = vld [vmem:[#allocation2 + $0x2] sm:$0x3f]  ;;  %v979_v60 = vmul.f32 %v978_v58, %v1802_v47  ;;  %v658_v61 = vmul.f32 %v657_v59, %v635_v30  ;;  %v1297_v62 = vstv %s1570_s13  ;;  %v1857_v48 = vld [vmem:[#allocation2 + $0x8] sm:$0x3f]  ;;  %s1548_s13 = sld [smem:[#allocation10 + $0x3c]] }
  0x64   :  { %v1808_v54 = vld [vmem:[#allocation2] sm:$0x3f]  ;;  %v809_v56 = vmul.f32 %v808_v53, %v806_v51  ;;  %v692_v53 = vstv %s1522_s8  ;;  %v1338_v59 = vstv %s1574_s12  ;;  %s1930_s8 = sld [smem:[#allocation10 + $0x51]]  ;;  %s1944_s12 = sld [smem:[#allocation10 + $0x45]] }
  0x65   :  { %v1288_v57 = vmul.f32 %v1287_v55, %v1808_v54  ;;  %v1816_v0 = vld [vmem:[#allocation2 + $0x2] sm:$0x3f]  ;;  %v531_v55 = vld [vmem:[#allocation2 + $0xa] sm:$0x3f] }
  0x66   :  { %v1831_v16 = vld [vmem:[#allocation2 + $0x2] sm:$0x3f] }
  0x67   :  { %439 = vrot.lane.b32.xlu1 %v437_v2, %s1685_s11  ;;  %308 = vrot.lane.b32.xlu0 %v306_v3, %s1689_s23  ;;  %v1298_v2 = vmul.f32 %v1297_v62, %v1808_v54  ;;  %v1139_v3 = vmul.f32 %v1138_v1, %v1816_v0  ;;  %v1339_v62 = vmul.f32 %v1338_v59, %v1831_v16  ;;  %v383_v1 = vstv %s1497_s15  ;;  %s1962_s15 = sld [smem:[#allocation10 + $0x52]] }
  0x6b   :  { %609 = vrot.lane.b32.xlu1 %v607_v7, %s1685_s11  ;;  %449 = vrot.lane.b32.xlu0 %v447_v8, %s1684_s10  ;;  %v818_v7 = vstv %s1531_s18  ;;  %v503_v8 = vmul.f32 %v502_v6, %v1822_v5  ;;  %s1523_s18 = sld [smem:[#allocation10 + $0x4f]] }
  0x6c   :  { %v819_v9 = vmul.f32 %v818_v7, %v806_v51  ;;  %v1874_v7 = vld [vmem:[#allocation2 + $0xa] sm:$0x3f] }
  0x6f   :  { %619 = vrot.lane.b32.xlu1 %v617_v11, %s1684_s10  ;;  %459 = vrot.lane.b32.xlu0 %v457_v12, %s1686_s14  ;;  %v988_v11 = vstv %s1545_s21  ;;  %v1149_v12 = vmul.f32 %v1148_v10, %v1816_v0  ;;  %s1562_s21 = sld [smem:[#allocation10 + $0x3d]] }
  0x70   :  { %v989_v13 = vmul.f32 %v988_v11, %v1802_v47 }
  0x73   :  { %470 = vrot.lane.b32.xlu1 %v468_v17, %s1687_s17  ;;  %779 = vrot.lane.b32.xlu0 %v777_v18, %s1685_s11  ;;  %v1308_v17 = vstv %s1571_s24  ;;  %v829_v18 = vmul.f32 %v828_v14, %v806_v51  ;;  %s1511_s24 = sld [smem:[#allocation10 + $0x5c]]  ;;  %v1023_v14 = vstv %s1549_s22  ;;  %s1997_s22 = sld [smem:[#allocation10 + $0x5f]] }
  0x74   :  { %v1309_v20 = vmul.f32 %v1308_v17, %v1831_v16 }
  0x77   :  { %950 = vrot.lane.b32.xlu1 %v948_v22, %s1685_s11  ;;  %629 = vrot.lane.b32.xlu0 %v627_v23, %s1686_s14  ;;  %v672_v22 = vstv %s1520_s1  ;;  %v512_v23 = vstv %s1507_s25  ;;  %s1536_s1 = sld [smem:[#allocation10 + $0x49]]  ;;  %s1879_s25 = sld [smem:[#allocation10]] }
  0x78   :  { %v673_v25 = vmul.f32 %v672_v22, %v1836_v21  ;;  %v513_v26 = vmul.f32 %v512_v23, %v1822_v5  ;;  %v862_v23 = vld [vmem:[#allocation2 + $0xa] sm:$0xf] }
  0x79   :  { %v553_v22 = vstv %s1511_s24  ;;  %s2011_s24 = sld [smem:[#allocation10 + $0x60]] }
  0x7b   :  { %480 = vrot.lane.b32.xlu1 %v478_v27, %s1689_s23  ;;  %789 = vrot.lane.b32.xlu0 %v787_v28, %s1684_s10  ;;  %v1158_v27 = vstv %s1559_s26  ;;  %v998_v28 = vstv %s1546_s27  ;;  %s1883_s26 = sld [smem:[#allocation10 + $0x4a]]  ;;  %s1885_s27 = sld [smem:[#allocation10 + $0x56]] }
  0x7c   :  { %v1159_v29 = vmul.f32 %v1158_v27, %v1816_v0  ;;  %v999_v30 = vmul.f32 %v998_v28, %v1802_v47  ;;  %v373_v47 = vstv %s1496_s6  ;;  %v554_v28 = vmul.f32 %v553_v22, %v531_v55  ;;  %s1916_s6 = sld [smem:[#allocation10 + $0x2]] }
  0x7f   :  { %960 = vrot.lane.b32.xlu1 %v958_v32, %s1684_s10  ;;  %640 = vrot.lane.b32.xlu0 %v638_v33, %s1687_s17  ;;  %v363_v32 = vstv %s1495_s28  ;;  %v1318_v33 = vstv %s1572_s29  ;;  %s1895_s28 = sld [smem:[#allocation10 + $0x3e]]  ;;  %s1897_s29 = sld [smem:[#allocation10 + $0x44]] }
  0x80   :  { %v364_v34 = vmul.f32 %v363_v32, %v361_v31  ;;  %v1319_v35 = vmul.f32 %v1318_v33, %v1831_v16 }
  0x81   :  { %v1034_v32 = vstv %s1883_s26  ;;  %v713_v33 = vstv %s1885_s27  ;;  %s2028_s26 = sld [smem:[#allocation10 + $0x61]]  ;;  %s2038_s27 = sld [smem:[#allocation10 + $0x32]] }
  0x83   :  { %800 = vrot.lane.b32.xlu1 %v798_v39, %s1686_s14  ;;  %1120 = vrot.lane.b32.xlu0 %v1118_v40, %s1685_s11  ;;  %v522_v39 = vstv %s1508_s30  ;;  %v683_v40 = vmul.f32 %v682_v38, %v1836_v21  ;;  %s1910_s30 = sld [smem:[#allocation10 + $0x5d]] }
  0x84   :  { %v523_v41 = vmul.f32 %v522_v39, %v1822_v5 }
  0x87   :  { %650 = vrot.lane.b32.xlu1 %v648_v43, %s1689_s23  ;;  %490 = vrot.lane.b32.xlu0 %v488_v44, %s1688_s20  ;;  %v1168_v43 = vstv %s1560_s5  ;;  %v1329_v44 = vmul.f32 %v1328_v42, %v1831_v16  ;;  %s1914_s5 = sld [smem:[#allocation10 + $0x31]] }
  0x88   :  { %v1169_v45 = vmul.f32 %v1168_v43, %v1816_v0  ;;  %v1926_v43 = vld [vmem:[#allocation2 + $0x8] sm:$0x3f] }
  0x89   :  { %v723_v59 = vstv %s1910_s30  ;;  %s2173_s30 = sld [smem:[#allocation10 + $0x36]] }
  0x8b   :  { %1130 = vrot.lane.b32.xlu1 %v1128_v49, %s1684_s10  ;;  %971 = vrot.lane.b32.xlu0 %v969_v50, %s1686_s14  ;;  %v843_v49 = vstv %s1534_s7  ;;  %v374_v50 = vmul.f32 %v373_v47, %v361_v31  ;;  %s1923_s7 = sld [smem:[#allocation10 + $0x4b]] }
  0x8c   :  { %v844_v51 = vmul.f32 %v843_v49, %v1857_v48 }
  0x8f   :  { %811 = vrot.lane.b32.xlu1 %v809_v56, %s1687_s17  ;;  %1290 = vrot.lane.b32.xlu0 %v1288_v57, %s1685_s11  ;;  %v533_v56 = vstv %s1509_s9  ;;  %v693_v57 = vmul.f32 %v692_v53, %v1836_v21  ;;  %s1937_s9 = sld [smem:[#allocation10 + $0x57]] }
  0x90   :  { %v534_v58 = vmul.f32 %v533_v56, %v531_v55 }
  0x93   :  { %981 = vrot.lane.b32.xlu1 %v979_v60, %s1687_s17  ;;  %660 = vrot.lane.b32.xlu0 %v658_v61, %s1688_s20  ;;  %v1865_v60 = vld [vmem:[#allocation2 + $0x8] sm:$0x3f]  ;;  %v1013_v61 = vstv %s1548_s13  ;;  %s1950_s13 = sld [smem:[#allocation10 + $0x3]] }
  0x94   :  { %v1014_v0 = vmul.f32 %v1013_v61, %v1865_v60  ;;  %v1941_v61 = vld [vmem:[#allocation2 + $0xa] sm:$0x3f] }
  0x97   :  { %1300 = vrot.lane.b32.xlu1 %v1298_v2, %s1684_s10  ;;  %1141 = vrot.lane.b32.xlu0 %v1139_v3, %s1686_s14  ;;  %v853_v2 = vstv %s1535_s16  ;;  %v384_v3 = vmul.f32 %v383_v1, %v361_v31  ;;  %v1906_v31 = vld [vmem:[#allocation2 + $0xa] sm:$0x3f]  ;;  %s1964_s16 = sld [smem:[#allocation10 + $0x58]] }
  0x98   :  { %v854_v6 = vmul.f32 %v853_v2, %v1857_v48 }
  0x9b   :  { %505 = vrot.lane.b32.xlu1 %v503_v8, %s1685_s11  ;;  %821 = vrot.lane.b32.xlu0 %v819_v9, %s1689_s23  ;;  %v703_v8 = vstv %s1523_s18  ;;  %v543_v9 = vstv %s1510_s19  ;;  %s1980_s18 = sld [smem:[#allocation10 + $0x5e]]  ;;  %s1982_s19 = sld [smem:[#allocation10 + $0x4c]] }
  0x9c   :  { %v704_v10 = vmul.f32 %v703_v8, %v1874_v7  ;;  %v544_v11 = vmul.f32 %v543_v9, %v531_v55 }
  0x9f   :  { %1151 = vrot.lane.b32.xlu1 %v1149_v12, %s1687_s17  ;;  %991 = vrot.lane.b32.xlu0 %v989_v13, %s1689_s23  ;;  %v1881_v12 = vld [vmem:[#allocation2 + $0x8] sm:$0x3f]  ;;  %v1183_v13 = vstv %s1562_s21  ;;  %s1995_s21 = sld [smem:[#allocation10 + $0x59]] }
  0xa3   :  { %831 = vrot.lane.b32.xlu1 %v829_v18, %s1688_s20  ;;  %1311 = vrot.lane.b32.xlu0 %v1309_v20, %s1686_s14  ;;  %v1184_v18 = vmul.f32 %v1183_v13, %v1881_v12  ;;  %v1024_v20 = vmul.f32 %v1023_v14, %v1865_v60 }
  0xa7   :  { %675 = vrot.lane.b32.xlu1 %v673_v25, %s1685_s11  ;;  %515 = vrot.lane.b32.xlu0 %v513_v26, %s1684_s10  ;;  %v864_v25 = vstv %s1536_s1  ;;  %s2013_s1 = sld [smem:[#allocation10 + $0x53]] }
  0xab   :  { %1161 = vrot.lane.b32.xlu1 %v1159_v29, %s1689_s23  ;;  %1001 = vrot.lane.b32.xlu0 %v999_v30, %s1688_s20  ;;  %v865_v29 = vmul.f32 %v864_v25, %v862_v23  ;;  %v256_v30 = vstv %s1879_s25  ;;  %s2026_s25 = sld [smem:[#allocation10 + $0x5a]] }
  0xac   :  { %v257_v39 = vmul.f32 %v256_v30, %v1754_v52 }
  0xaf   :  { %366 = vrot.lane.b32.xlu1 %v364_v34, %s1687_s17  ;;  %1321 = vrot.lane.b32.xlu0 %v1319_v35, %s1687_s17 }
  0xb3   :  { %685 = vrot.lane.b32.xlu1 %v683_v40, %s1684_s10  ;;  %525 = vrot.lane.b32.xlu0 %v523_v41, %s1686_s14  ;;  %v1035_v40 = vmul.f32 %v1034_v32, %v1906_v31  ;;  %v714_v41 = vmul.f32 %v713_v33, %v1874_v7 }
  0xb7   :  { %1331 = vrot.lane.b32.xlu1 %v1329_v44, %s1689_s23  ;;  %1171 = vrot.lane.b32.xlu0 %v1169_v45, %s1688_s20  ;;  %v1353_v44 = vstv %s1895_s28  ;;  %v1193_v45 = vstv %s1897_s29  ;;  %s1533_s28 = sld [smem:[#allocation10 + $0x34]]  ;;  %s1691_s29 = smov 50  }
  0xb8   :  { %v1354_v55 = vmul.f32 %v1353_v44, %v1926_v43  ;;  %v1194_v56 = vmul.f32 %v1193_v45, %v1881_v12  ;;  %v1363_v45 = vstv %s1944_s12 }
  0xbb   :  { %376 = vrot.lane.b32.xlu1 %v374_v50, %s1689_s23  ;;  %846 = vrot.lane.b32.xlu0 %v844_v51, %s1685_s11  ;;  %v432_v51 = vstv %s1901_s0  ;;  %s1547_s0 = sld [smem:[#allocation10 + $0x35]] }
  0xbc   :  { %v433_v1 = vmul.f32 %v432_v51, %v1763_v63  ;;  %v724_v63 = vmul.f32 %v723_v59, %v1874_v7  ;;  %v1364_v59 = vmul.f32 %v1363_v45, %v1926_v43 }
  0xbf   :  { %695 = vrot.lane.b32.xlu1 %v693_v57, %s1686_s14  ;;  %536 = vrot.lane.b32.xlu0 %v534_v58, %s1687_s17 }
  0xc3   :  { %1341 = vrot.lane.b32.xlu1 %v1339_v62, %s1688_s20  ;;  %1016 = vrot.lane.b32.xlu0 %v1014_v0, %s1685_s11  ;;  %v875_v62 = vstv %s1912_s4  ;;  %s1692_s4 = smov 49  }
  0xc4   :  { %v876_v14 = vmul.f32 %v875_v62, %v1941_v61 }
  0xc7   :  { %386 = vrot.lane.b32.xlu1 %v384_v3, %s1688_s20  ;;  %856 = vrot.lane.b32.xlu0 %v854_v6, %s1684_s10  ;;  %v328_v3 = vstv %s1914_s5  ;;  %s1575_s5 = sld [smem:[#allocation10 + $0x37]] }
  0xc8   :  { %v329_v33 = vmul.f32 %v328_v3, %v1747_v46 }
  0xc9   :  { %v1887_v16 = vpop.permute.xlu1 %345  ;;  %v1889_v17 = vpop.permute.xlu0 %335 }
  0xcb   :  { %706 = vrot.lane.b32.xlu1 %v704_v10, %s1687_s17  ;;  %546 = vrot.lane.b32.xlu0 %v544_v11, %s1689_s23  ;;  %v602_v11 = vstv %s1916_s6  ;;  %s1693_s6 = smov 47  }
  0xcc   :  { %v603_v7 = vmul.f32 %v602_v11, %v1768_v4 }
  0xcd   :  { %v1899_v26 = vpop.permute.xlu0 %355  ;;  %v286_v27 = vpop.permute.xlu1 %285 }
  0xce   :  { %v287_v49 = vrot.slane %v286_v27, 2 }
  0xcf   :  { %1186 = vrot.lane.b32.xlu1 %v1184_v18, %s1685_s11  ;;  %1026 = vrot.lane.b32.xlu0 %v1024_v20, %s1684_s10  ;;  %v1956_v18 = vld [vmem:[#allocation2 + $0xa] sm:$0x3f]  ;;  %v1204_v20 = vstv %s1923_s7  ;;  %s1694_s7 = smov 46  }
  0xd0   :  { %v289_v8 = vsel %vm288_vm6, %v286_v27, %v287_v49  ;;  %v1044_v27 = vstv %s1930_s8  ;;  %s1695_s8 = smov 45  }
  0xd1   :  { %v298_v34 = vpop.permute.xlu1 %297  ;;  %v264_v35 = vpop.permute.xlu0 %263  ;;  %v1045_v4 = vmul.f32 %v1044_v27, %v1906_v31  ;;  %v2008_v27 = vld [vmem:[#allocation2 + $0xa] sm:$0x3f] }
  0xd2   :  { %v265_v38 = vrot.slane %v264_v35, 2  ;;  %v299_v57 = vrot.slane %v298_v34, 6 }
  0xd3   :  { %556 = vrot.lane.b32.xlu1 %v554_v28, %s1688_s20  ;;  %867 = vrot.lane.b32.xlu0 %v865_v29, %s1686_s14 }
  0xd4   :  { %v267_v42 = vsel %vm266_vm4, %v264_v35, %v265_v38  ;;  %v301_v22 = vsel %vm300_vm7, %v299_v57, %v298_v34  ;;  %v772_v57 = vstv %s1950_s13 }
  0xd5   :  { %v320_v52 = vpop.permute.xlu1 %319  ;;  %v275_v47 = vpop.permute.xlu0 %274  ;;  %v269_v53 = vadd.f32 %v267_v42, %v257_v39 }
  0xd6   :  { %v276_v50 = vrot.slane %v275_v47, 2  ;;  %v321_v23 = vrot.slane %v320_v52, 6 }
  0xd7   :  { %1037 = vrot.lane.b32.xlu1 %v1035_v40, %s1686_s14  ;;  %716 = vrot.lane.b32.xlu0 %v714_v41, %s1689_s23  ;;  %v1205_v40 = vmul.f32 %v1204_v20, %v1956_v18  ;;  %v885_v41 = vstv %s1937_s9 }
  0xd8   :  { %v278_v58 = vsel %vm277_vm5, %v275_v47, %v276_v50  ;;  %v323_v42 = vsel %vm322_vm9, %v321_v23, %v320_v52 }
  0xd9   :  { %v280_v0 = vadd.f32 %v278_v58, %v269_v53  ;;  %v440_v2 = vpop.permute.xlu1 %439  ;;  %v309_v6 = vpop.permute.xlu0 %308  ;;  %v886_v58 = vmul.f32 %v885_v41, %v1941_v61 }
  0xda   :  { %v441_v9 = vrot.slane %v440_v2, 2  ;;  %v310_v10 = vrot.slane %v309_v6, 6 }
  0xdb   :  { %v291_v13 = vadd.f32 %v289_v8, %v280_v0  ;;  %1356 = vrot.lane.b32.xlu1 %v1354_v55, %s1685_s11  ;;  %1196 = vrot.lane.b32.xlu0 %v1194_v56, %s1684_s10  ;;  %s1969_s11 = sld [smem:[#allocation10 + $0x4]] }
  0xdc   :  { %v442_v25 = vsel %vm266_vm4, %v440_v2, %v441_v9  ;;  %v312_v34 = vsel %vm311_vm8, %v310_v10, %v309_v6  ;;  %v1054_v2 = vstv %s1964_s16  ;;  %v773_v9 = vmul.f32 %v772_v57, %v1778_v15 }
  0xdd   :  { %v444_v28 = vadd.f32 %v442_v25, %v433_v1  ;;  %v303_v29 = vadd.f32 %v301_v22, %v291_v13  ;;  %v610_v30 = vpop.permute.xlu1 %609  ;;  %v450_v32 = vpop.permute.xlu0 %449  ;;  %v1214_v1 = vstv %s1962_s15  ;;  %v1055_v20 = vmul.f32 %v1054_v2, %v1906_v31 }
  0xde   :  { %v611_v35 = vrot.slane %v610_v30, 2  ;;  %v451_v38 = vrot.slane %v450_v32, 2  ;;  %v895_v25 = vstv %s1980_s18  ;;  %v1374_v15 = vstv %s1982_s19 }
  0xdf   :  { %v314_v39 = vadd.f32 %v312_v34, %v303_v29  ;;  %726 = vrot.lane.b32.xlu1 %v724_v63, %s1688_s20  ;;  %878 = vrot.lane.b32.xlu0 %v876_v14, %s1687_s17  ;;  %v1215_v14 = vmul.f32 %v1214_v1, %v1956_v18 }
  0xe0   :  { %v612_v46 = vsel %vm266_vm4, %v610_v30, %v611_v35  ;;  %v452_v44 = vsel %vm277_vm5, %v450_v32, %v451_v38  ;;  %v896_v35 = vmul.f32 %v895_v25, %v1941_v61  ;;  %v1375_v38 = vmul.f32 %v1374_v15, %v2008_v27 }
  0xe1   :  { %v325_v47 = vadd.f32 %v323_v42, %v314_v39  ;;  %v614_v49 = vadd.f32 %v612_v46, %v603_v7  ;;  %v454_v50 = vadd.f32 %v452_v44, %v444_v28  ;;  %v620_v51 = vpop.permute.xlu1 %619  ;;  %v460_v53 = vpop.permute.xlu0 %459  ;;  %v943_v63 = vstv %s1969_s11 }
  0xe2   :  { %v621_v55 = vrot.slane %v620_v51, 2  ;;  %v461_v56 = vrot.slane %v460_v53, 2  ;;  %v944_v7 = vmul.f32 %v943_v63, %v1783_v19  ;;  %v1064_v19 = vstv %s1997_s22 }
  0xe3   :  { %v1985_v52 = vadd.f32 %v329_v33, %v325_v47  ;;  %1207 = vrot.lane.b32.xlu1 %v1205_v40, %s1686_s14  ;;  %1047 = vrot.lane.b32.xlu0 %v1045_v4, %s1687_s17  ;;  %v1224_v4 = vstv %s1995_s21 }
  0xe4   :  { %v622_v62 = vsel %vm277_vm5, %v620_v51, %v621_v55  ;;  %v462_v0 = vsel %vm288_vm6, %v460_v53, %v461_v56  ;;  %v1225_v47 = vmul.f32 %v1224_v4, %v1956_v18  ;;  %v1234_v53 = vstv %s2011_s24 }
  0xe5   :  { %v624_v3 = vadd.f32 %v622_v62, %v614_v49  ;;  %v464_v6 = vadd.f32 %v462_v0, %v454_v50  ;;  %v471_v8 = vpop.permute.xlu1 %470  ;;  %v780_v10 = vpop.permute.xlu0 %779  ;;  %v1065_v49 = vmul.f32 %v1064_v19, %v1906_v31  ;;  %v1384_v55 = vstv %s2013_s1 }
  0xe6   :  { %v472_v11 = vrot.slane %v471_v8, 6  ;;  %v781_v13 = vrot.slane %v780_v10, 2  ;;  %v1235_v31 = vmul.f32 %v1234_v53, %v1956_v18  ;;  %v1385_v2 = vmul.f32 %v1384_v55, %v2008_v27 }
  0xe7   :  { %888 = vrot.lane.b32.xlu1 %v886_v58, %s1689_s23  ;;  %1366 = vrot.lane.b32.xlu0 %v1364_v59, %s1684_s10  ;;  %s2016_s10 = sld [smem:[#allocation10 + $0x5]] }
  0xe8   :  { %v473_v22 = vsel %vm300_vm7, %v472_v11, %v471_v8  ;;  %v782_v23 = vsel %vm266_vm4, %v780_v10, %v781_v13  ;;  %v1394_v8 = vstv %s2026_s25 }
  0xe9   :  { %v475_v28 = vadd.f32 %v473_v22, %v464_v6  ;;  %v784_v29 = vadd.f32 %v782_v23, %v773_v9  ;;  %v951_v30 = vpop.permute.xlu1 %950  ;;  %v630_v32 = vpop.permute.xlu0 %629  ;;  %v1404_v9 = vstv %s2028_s26  ;;  %v1395_v18 = vmul.f32 %v1394_v8, %v2008_v27 }
  0xea   :  { %v952_v33 = vrot.slane %v951_v30, 2  ;;  %v631_v34 = vrot.slane %v630_v32, 2  ;;  %v1405_v23 = vmul.f32 %v1404_v9, %v2008_v27 }
  0xeb   :  { %1217 = vrot.lane.b32.xlu1 %v1215_v14, %s1687_s17  ;;  %1057 = vrot.lane.b32.xlu0 %v1055_v20, %s1689_s23 }
  0xec   :  { %v953_v39 = vsel %vm266_vm4, %v951_v30, %v952_v33  ;;  %v632_v40 = vsel %vm288_vm6, %v630_v32, %v631_v34 }
  0xed   :  { %v955_v41 = vadd.f32 %v953_v39, %v944_v7  ;;  %v634_v42 = vadd.f32 %v632_v40, %v624_v3  ;;  %v481_v46 = vpop.permute.xlu1 %480  ;;  %v790_v44 = vpop.permute.xlu0 %789  ;;  %v1113_v1 = vstv %s2016_s10 }
  0xee   :  { %v482_v45 = vrot.slane %v481_v46, 6  ;;  %v791_v61 = vrot.slane %v790_v44, 2  ;;  %v1114_v63 = vmul.f32 %v1113_v1, %v1795_v36 }
  0xef   :  { %898 = vrot.lane.b32.xlu1 %v896_v35, %s1688_s20  ;;  %1377 = vrot.lane.b32.xlu0 %v1375_v38, %s1686_s14  ;;  %s2050_s14 = sld [smem:[#allocation10 + $0x6]] }
  0xf0   :  { %v483_v50 = vsel %vm311_vm8, %v482_v45, %v481_v46  ;;  %v792_v51 = vsel %vm277_vm5, %v790_v44, %v791_v61 }
  0xf1   :  { %v485_v56 = vadd.f32 %v483_v50, %v475_v28  ;;  %v794_v57 = vadd.f32 %v792_v51, %v784_v29  ;;  %v961_v58 = vpop.permute.xlu1 %960  ;;  %v641_v59 = vpop.permute.xlu0 %640  ;;  %v498_v28 = vstv %s2038_s27 }
  0xf2   :  { %v962_v62 = vrot.slane %v961_v58, 2  ;;  %v642_v0 = vrot.slane %v641_v59, 6  ;;  %v499_v34 = vmul.f32 %v498_v28, %v1822_v5 }
  0xf3   :  { %1227 = vrot.lane.b32.xlu1 %v1225_v47, %s1689_s23  ;;  %1067 = vrot.lane.b32.xlu0 %v1065_v49, %s1688_s20 }
  0xf4   :  { %v963_v3 = vsel %vm277_vm5, %v961_v58, %v962_v62  ;;  %v643_v6 = vsel %vm300_vm7, %v642_v0, %v641_v59 }
  0xf5   :  { %v965_v10 = vadd.f32 %v963_v3, %v955_v41  ;;  %v645_v11 = vadd.f32 %v643_v6, %v634_v42  ;;  %v801_v13 = vpop.permute.xlu1 %800  ;;  %v1121_v14 = vpop.permute.xlu0 %1120  ;;  %v1283_v42 = vstv %s2050_s14 }
  0xf6   :  { %v802_v20 = vrot.slane %v801_v13, 6  ;;  %v1122_v22 = vrot.slane %v1121_v14, 2  ;;  %v1284_v49 = vmul.f32 %v1283_v42, %v1808_v54 }
  0xf7   :  { %1237 = vrot.lane.b32.xlu1 %v1235_v31, %s1688_s20  ;;  %1387 = vrot.lane.b32.xlu0 %v1385_v2, %s1687_s17  ;;  %s1519_s17 = sld [smem:[#allocation10 + $0x33]] }
  0xf8   :  { %v803_v25 = vsel %vm288_vm6, %v802_v20, %v801_v13  ;;  %v1123_v15 = vsel %vm266_vm4, %v1121_v14, %v1122_v22 }
  0xf9   :  { %v805_v29 = vadd.f32 %v803_v25, %v794_v57  ;;  %v1125_v36 = vadd.f32 %v1123_v15, %v1114_v63  ;;  %v651_v7 = vpop.permute.xlu1 %650  ;;  %v491_v30 = vpop.permute.xlu0 %490 }
  0xfa   :  { %v652_v32 = vrot.slane %v651_v7, 6  ;;  %v492_v33 = vrot.slane %v491_v30, 6 }
  0xfb   :  { %1397 = vrot.lane.b32.xlu0 %v1395_v18, %s1689_s23  ;;  %1407 = vrot.lane.b32.xlu1 %v1405_v23, %s1688_s20  ;;  %s1690_s20 = smov 51  }
  0xfc   :  { %v653_v27 = vsel %vm311_vm8, %v652_v32, %v651_v7  ;;  %v493_v35 = vsel %vm322_vm9, %v492_v33, %v491_v30 }
  0xfd   :  { %v655_v38 = vadd.f32 %v653_v27, %v645_v11  ;;  %v495_v39 = vadd.f32 %v493_v35, %v485_v56  ;;  %v1131_v40 = vpop.permute.xlu1 %1130  ;;  %v972_v4 = vpop.permute.xlu0 %971  ;;  %v668_v57 = vstv %s1519_s17 }
  0xfe   :  { %v1132_v19 = vrot.slane %v1131_v40, 2  ;;  %v973_v41 = vrot.slane %v972_v4, 6  ;;  %v669_v2 = vmul.f32 %v668_v57, %v1836_v21 }
  0xff   :  { %v2065_v46 = vadd.f32 %v499_v34, %v495_v39 }
 0x100   :  { %v1133_v44 = vsel %vm277_vm5, %v1131_v40, %v1132_v19  ;;  %v974_v45 = vsel %vm288_vm6, %v973_v41, %v972_v4 }
 0x101   :  { %v1135_v61 = vadd.f32 %v1133_v44, %v1125_v36  ;;  %v976_v5 = vadd.f32 %v974_v45, %v965_v10  ;;  %v812_v47 = vpop.permute.xlu1 %811  ;;  %v1291_v50 = vpop.permute.xlu0 %1290 }
 0x102   :  { %v813_v51 = vrot.slane %v812_v47, 6  ;;  %v1292_v53 = vrot.slane %v1291_v50, 2 }
 0x104   :  { %v814_v55 = vsel %vm300_vm7, %v813_v51, %v812_v47  ;;  %v1293_v56 = vsel %vm266_vm4, %v1291_v50, %v1292_v53 }
 0x105   :  { %v816_v58 = vadd.f32 %v814_v55, %v805_v29  ;;  %v1295_v59 = vadd.f32 %v1293_v56, %v1284_v49  ;;  %v982_v62 = vpop.permute.xlu1 %981  ;;  %v661_v0 = vpop.permute.xlu0 %660 }
 0x106   :  { %v983_v1 = vrot.slane %v982_v62, 6  ;;  %v662_v31 = vrot.slane %v661_v0, 6 }
 0x108   :  { %v984_v3 = vsel %vm300_vm7, %v983_v1, %v982_v62  ;;  %v663_v54 = vsel %vm322_vm9, %v662_v31, %v661_v0 }
 0x109   :  { %v986_v6 = vadd.f32 %v984_v3, %v976_v5  ;;  %v665_v8 = vadd.f32 %v663_v54, %v655_v38  ;;  %v1301_v9 = vpop.permute.xlu1 %1300  ;;  %v1142_v10 = vpop.permute.xlu0 %1141  ;;  %v347_v3 = vrot.slane %v1887_v16, 2 }
 0x10a   :  { %v1302_v11 = vrot.slane %v1301_v9, 2  ;;  %v1143_v13 = vrot.slane %v1142_v10, 6 }
 0x10b   :  { %v2075_v63 = vadd.f32 %v669_v2, %v665_v8 }
 0x10c   :  { %v1303_v14 = vsel %vm277_vm5, %v1301_v9, %v1302_v11  ;;  %v1144_v20 = vsel %vm288_vm6, %v1143_v13, %v1142_v10  ;;  %v348_v10 = vsel %vm277_vm5, %v1887_v16, %v347_v3  ;;  %v357_v11 = vrot.slane %v1899_v26, 2 }
 0x10d   :  { %v1305_v22 = vadd.f32 %v1303_v14, %v1295_v59  ;;  %v1146_v18 = vadd.f32 %v1144_v20, %v1135_v61  ;;  %v2079_v23 = vpop.permute.xlu1 %505  ;;  %v822_v21 = vpop.permute.xlu0 %821  ;;  %v337_v59 = vrot.slane %v1889_v17, 2 }
 0x10e   :  { %v823_v25 = vrot.slane %v822_v21, 6 }
 0x10f   :  { %v338_v54 = vsel %vm266_vm4, %v1889_v17, %v337_v59 }
 0x110   :  { %v824_v15 = vsel %vm311_vm8, %v823_v25, %v822_v21  ;;  %v358_v21 = vsel %vm288_vm6, %v1899_v26, %v357_v11 }
 0x111   :  { %v826_v28 = vadd.f32 %v824_v15, %v816_v58  ;;  %v1152_v29 = vpop.permute.xlu1 %1151  ;;  %v992_v36 = vpop.permute.xlu0 %991  ;;  %v507_v15 = vrot.slane %v2079_v23, 2 }
 0x112   :  { %v1153_v7 = vrot.slane %v1152_v29, 6  ;;  %v993_v30 = vrot.slane %v992_v36, 6 }
 0x113   :  { %v508_v26 = vsel %vm266_vm4, %v2079_v23, %v507_v15 }
 0x114   :  { %v1154_v32 = vsel %vm300_vm7, %v1153_v7, %v1152_v29  ;;  %v994_v33 = vsel %vm311_vm8, %v993_v30, %v992_v36 }
 0x115   :  { %v2084_v34 = vadd.f32 %v1154_v32, %v1146_v18  ;;  %v2086_v27 = vadd.f32 %v994_v33, %v986_v6  ;;  %v832_v35 = vpop.permute.xlu1 %831  ;;  %v1312_v38 = vpop.permute.xlu0 %1311  ;;  %v340_v6 = vadd.f32 %v338_v54, %v1985_v52 }
 0x116   :  { %v833_v39 = vrot.slane %v832_v35, 6  ;;  %v1313_v40 = vrot.slane %v1312_v38, 6 }
 0x117   :  { %v350_v14 = vadd.f32 %v348_v10, %v340_v6 }
 0x118   :  { %v834_v4 = vsel %vm322_vm9, %v833_v39, %v832_v35  ;;  %v1314_v19 = vsel %vm288_vm6, %v1313_v40, %v1312_v38 }
 0x119   :  { %v2090_v41 = vadd.f32 %v834_v4, %v826_v28  ;;  %v1316_v42 = vadd.f32 %v1314_v19, %v1305_v22  ;;  %v2092_v44 = vpop.permute.xlu1 %675  ;;  %v516_v45 = vpop.permute.xlu0 %515  ;;  %v360_v52 = vadd.f32 %v358_v21, %v350_v14 }
 0x11a   :  { %v517_v32 = vrot.slane %v516_v45, 2 }
 0x11d   :  { %v2094_v61 = vpop.permute.xlu1 %1161  ;;  %v2096_v5 = vpop.permute.xlu0 %1001 }
 0x121   :  { %v367_v47 = vpop.permute.xlu1 %366  ;;  %v1322_v49 = vpop.permute.xlu0 %1321 }
 0x122   :  { %v1323_v50 = vrot.slane %v1322_v49, 6  ;;  %v368_v13 = vrot.slane %v367_v47, 6 }
 0x124   :  { %v1324_v51 = vsel %vm300_vm7, %v1323_v50, %v1322_v49  ;;  %v369_v17 = vsel %vm300_vm7, %v368_v13, %v367_v47  ;;  %v510_v49 = vadd.f32 %v508_v26, %v2065_v46  ;;  %v677_v46 = vrot.slane %v2092_v44, 2 }
 0x125   :  { %v1326_v53 = vadd.f32 %v1324_v51, %v1316_v42  ;;  %v2099_v55 = vpop.permute.xlu1 %685  ;;  %v526_v56 = vpop.permute.xlu0 %525  ;;  %v371_v29 = vadd.f32 %v369_v17, %v360_v52  ;;  %v518_v42 = vsel %vm277_vm5, %v516_v45, %v517_v32 }
 0x126   :  { %v527_v38 = vrot.slane %v526_v56, 2  ;;  %v520_v23 = vadd.f32 %v518_v42, %v510_v49  ;;  %v687_v3 = vrot.slane %v2099_v55, 2  ;;  %v678_v10 = vsel %vm266_vm4, %v2092_v44, %v677_v46 }
 0x127   :  { %v680_v17 = vadd.f32 %v678_v10, %v2075_v63 }
 0x128   :  { %v528_v51 = vsel %vm288_vm6, %v526_v56, %v527_v38 }
 0x129   :  { %v1332_v57 = vpop.permute.xlu1 %1331  ;;  %v2101_v58 = vpop.permute.xlu0 %1171 }
 0x12a   :  { %v1333_v62 = vrot.slane %v1332_v57, 6 }
 0x12c   :  { %v1334_v0 = vsel %vm311_vm8, %v1333_v62, %v1332_v57  ;;  %v530_v62 = vadd.f32 %v528_v51, %v520_v23  ;;  %v1173_v23 = vrot.slane %v2101_v58, 6 }
 0x12d   :  { %v1336_v1 = vadd.f32 %v1334_v0, %v1326_v53  ;;  %v377_v31 = vpop.permute.xlu1 %376  ;;  %v2105_v2 = vpop.permute.xlu0 %846 }
 0x12e   :  { %v378_v20 = vrot.slane %v377_v31, 6 }
 0x130   :  { %v379_v28 = vsel %vm311_vm8, %v378_v20, %v377_v31 }
 0x131   :  { %v696_v8 = vpop.permute.xlu1 %695  ;;  %v537_v9 = vpop.permute.xlu0 %536  ;;  %v381_v35 = vadd.f32 %v379_v28, %v371_v29 }
 0x132   :  { %v538_v47 = vrot.slane %v537_v9, 6  ;;  %v697_v11 = vrot.slane %v696_v8, 2 }
 0x134   :  { %v539_v45 = vsel %vm300_vm7, %v538_v47, %v537_v9  ;;  %v698_v44 = vsel %vm288_vm6, %v696_v8, %v697_v11 }
 0x135   :  { %v1342_v22 = vpop.permute.xlu1 %1341  ;;  %v2114_v18 = vpop.permute.xlu0 %1016 }
 0x136   :  { %v1343_v25 = vrot.slane %v1342_v22, 6 }
 0x138   :  { %v1344_v16 = vsel %vm322_vm9, %v1343_v25, %v1342_v22  ;;  %v688_v22 = vsel %vm277_vm5, %v2099_v55, %v687_v3 }
 0x139   :  { %v2122_v36 = vadd.f32 %v1344_v16, %v1336_v1  ;;  %v387_v7 = vpop.permute.xlu1 %386  ;;  %v2124_v30 = vpop.permute.xlu0 %856  ;;  %v541_v1 = vadd.f32 %v539_v45, %v530_v62  ;;  %v690_v15 = vadd.f32 %v688_v22, %v680_v17  ;;  %v1009_v45 = vstv %s1547_s0 }
 0x13a   :  { %v388_v33 = vrot.slane %v387_v7, 6  ;;  %v858_v62 = vrot.slane %v2124_v30, 2 }
 0x13b   :  { %v700_v63 = vadd.f32 %v698_v44, %v690_v15 }
 0x13c   :  { %v389_v39 = vsel %vm322_vm9, %v388_v33, %v387_v7  ;;  %v1003_v33 = vrot.slane %v2096_v5, 6 }
 0x13d   :  { %v2129_v40 = vadd.f32 %v389_v39, %v381_v35  ;;  %v707_v4 = vpop.permute.xlu1 %706  ;;  %v547_v19 = vpop.permute.xlu0 %546  ;;  %v839_v35 = vstv %s1533_s28  ;;  %v1163_v39 = vrot.slane %v2094_v61, 6 }
 0x13e   :  { %v548_v53 = vrot.slane %v547_v19, 6  ;;  %v708_v21 = vrot.slane %v707_v4, 6 }
 0x13f   :  { %v2135_v50 = vrot.slane %v2129_v40, %v1733_v37 }
 0x140   :  { %v549_v0 = vsel %vm311_vm8, %v548_v53, %v547_v19  ;;  %v709_v55 = vsel %vm300_vm7, %v708_v21, %v707_v4  ;;  %v848_v19 = vrot.slane %v2105_v2, 2  ;;  %v840_v4 = vmul.f32 %v839_v35, %v1857_v48 }
 0x141   :  { %v2138_v57 = vpop.permute.xlu1 %1186  ;;  %v2140_v59 = vpop.permute.xlu0 %1026  ;;  %409 = vrot.lane.b32.xlu0 %v2135_v50, %s1690_s20  ;;  %v551_v6 = vadd.f32 %v549_v0, %v541_v1  ;;  %v711_v7 = vadd.f32 %v709_v55, %v700_v63  ;;  %v1004_v53 = vsel %vm322_vm9, %v1003_v33, %v2096_v5  ;;  %v1164_v48 = vsel %vm311_vm8, %v1163_v39, %v2094_v61 }
 0x142   :  { %v849_v0 = vsel %vm266_vm4, %v2105_v2, %v848_v19  ;;  %v1018_v1 = vrot.slane %v2114_v18, 2  ;;  %v1006_v5 = vadd.f32 %v1004_v53, %v2086_v27  ;;  %v841_v3 = vadd.f32 %v840_v4, %v2090_v41 }
 0x143   :  { %v1174_v61 = vsel %vm322_vm9, %v1173_v23, %v2101_v58  ;;  %v859_v2 = vsel %vm277_vm5, %v2124_v30, %v858_v62  ;;  %v1028_v27 = vrot.slane %v2140_v59, 2  ;;  %v1166_v41 = vadd.f32 %v1164_v48, %v2084_v34 }
 0x144   :  { %v1019_v22 = vsel %vm266_vm4, %v2114_v18, %v1018_v1 }
 0x145   :  { %v557_v31 = vpop.permute.xlu1 %556  ;;  %v2147_v56 = vpop.permute.xlu0 %867  ;;  %v1176_v44 = vadd.f32 %v1174_v61, %v1166_v41  ;;  %v1029_v34 = vsel %vm277_vm5, %v2140_v59, %v1028_v27 }
 0x146   :  { %v558_v54 = vrot.slane %v557_v31, 6 }
 0x148   :  { %v559_v13 = vsel %vm322_vm9, %v558_v54, %v557_v31  ;;  %v869_v31 = vrot.slane %v2147_v56, 6  ;;  %v1010_v54 = vmul.f32 %v1009_v45, %v1865_v60  ;;  %v851_v60 = vadd.f32 %v849_v0, %v841_v3 }
 0x149   :  { %v2153_v9 = vadd.f32 %v559_v13, %v551_v6  ;;  %v2155_v14 = vpop.permute.xlu1 %1037  ;;  %v717_v20 = vpop.permute.xlu0 %716  ;;  %v1179_v6 = vstv %s2173_s30 }
 0x14a   :  { %v718_v52 = vrot.slane %v717_v20, 6  ;;  %v870_v21 = vsel %vm288_vm6, %v869_v31, %v2147_v56  ;;  %v1039_v17 = vrot.slane %v2155_v14, 6  ;;  %v861_v30 = vadd.f32 %v859_v2, %v851_v60 }
 0x14b   :  { %v2162_v25 = vrot.slane %v2153_v9, %v1733_v37  ;;  %v1180_v15 = vmul.f32 %v1179_v6, %v1881_v12 }
 0x14c   :  { %v719_v29 = vsel %vm311_vm8, %v718_v52, %v717_v20  ;;  %v1188_v20 = vrot.slane %v2138_v57, 2  ;;  %v1011_v52 = vadd.f32 %v1010_v54, %v1006_v5  ;;  %v872_v33 = vadd.f32 %v870_v21, %v861_v30 }
 0x14d   :  { %v2165_v28 = vpop.permute.xlu1 %1356  ;;  %579 = vrot.lane.b32.xlu1 %v2162_v25, %s1691_s29  ;;  %v2169_v16 = vpop.permute.xlu0 %1196  ;;  %v721_v38 = vadd.f32 %v719_v29, %v711_v7  ;;  %v1040_v35 = vsel %vm288_vm6, %v1039_v17, %v2155_v14  ;;  %v1181_v39 = vadd.f32 %v1180_v15, %v1176_v44  ;;  %v393_v21 = vcombine.high %v2129_v40, %v2129_v40 }
 0x14e   :  { %v1198_v29 = vrot.slane %v2169_v16, 2  ;;  %v1189_v56 = vsel %vm266_vm4, %v2138_v57, %v1188_v20  ;;  %v1349_v30 = vstv %s1575_s5 }
 0x14f   :  { %v1191_v45 = vadd.f32 %v1189_v56, %v1181_v39  ;;  %v578_v56 = vcombine.high %v2162_v25, %v2162_v25 }
 0x151   :  { %v727_v8 = vpop.permute.xlu1 %726  ;;  %v879_v32 = vpop.permute.xlu0 %878 }
 0x152   :  { %v728_v26 = vrot.slane %v727_v8, 6  ;;  %v880_v13 = vrot.slane %v879_v32, 6 }
 0x154   :  { %v729_v42 = vsel %vm322_vm9, %v728_v26, %v727_v8  ;;  %v881_v18 = vsel %vm300_vm7, %v880_v13, %v879_v32  ;;  %v1021_v8 = vadd.f32 %v1019_v22, %v1011_v52  ;;  %v1199_v32 = vsel %vm277_vm5, %v2169_v16, %v1198_v29 }
 0x155   :  { %v2180_v47 = vadd.f32 %v729_v42, %v721_v38  ;;  %v1208_v49 = vpop.permute.xlu1 %1207  ;;  %v1048_v51 = vpop.permute.xlu0 %1047  ;;  %v883_v59 = vadd.f32 %v881_v18, %v872_v33  ;;  %v1201_v31 = vadd.f32 %v1199_v32, %v1191_v45  ;;  %v1350_v29 = vmul.f32 %v1349_v30, %v1926_v43 }
 0x156   :  { %v1049_v7 = vrot.slane %v1048_v51, 6  ;;  %v1209_v26 = vrot.slane %v1208_v49, 6  ;;  %v1031_v19 = vadd.f32 %v1029_v34, %v1021_v8  ;;  %v1358_v34 = vrot.slane %v2165_v28, 2 }
 0x157   :  { %v2188_v46 = vrot.slane %v2180_v47, %v1733_v37  ;;  %v563_v18 = vcombine.high %v2153_v9, %v2153_v9  ;;  %v408_v8 = vcombine.high %v2135_v50, %v2135_v50 }
 0x158   :  { %v1050_v53 = vsel %vm300_vm7, %v1049_v7, %v1048_v51  ;;  %v1042_v62 = vadd.f32 %v1040_v35, %v1031_v19  ;;  %v1210_v48 = vsel %vm288_vm6, %v1209_v26, %v1208_v49  ;;  %v733_v7 = vcombine.high %v2180_v47, %v2180_v47 }
 0x159   :  { %v889_v10 = vpop.permute.xlu1 %888  ;;  %v2200_v11 = vpop.permute.xlu0 %1366  ;;  %749 = vrot.lane.b32.xlu0 %v2188_v46, %s1692_s4  ;;  %v1212_v61 = vadd.f32 %v1210_v48, %v1201_v31  ;;  %v1359_v43 = vsel %vm266_vm4, %v2165_v28, %v1358_v34  ;;  %v1351_v35 = vadd.f32 %v1350_v29, %v2122_v36 }
 0x15a   :  { %v890_v58 = vrot.slane %v889_v10, 6  ;;  %v1052_v5 = vadd.f32 %v1050_v53, %v1042_v62  ;;  %v1368_v40 = vrot.slane %v2200_v11, 2  ;;  %v747_v25 = vrot.slane %v733_v7, %v1733_v37 }
 0x15b   :  { %v1361_v50 = vadd.f32 %v1359_v43, %v1351_v35 }
 0x15c   :  { %v891_v12 = vsel %vm311_vm8, %v890_v58, %v889_v10  ;;  %v1369_v9 = vsel %vm277_vm5, %v2200_v11, %v1368_v40  ;;  %v748_v11 = vcombine.high %v2188_v46, %v2188_v46 }
 0x15d   :  { %v1218_v55 = vpop.permute.xlu1 %1217  ;;  %v1058_v63 = vpop.permute.xlu0 %1057  ;;  %v893_v14 = vadd.f32 %v891_v12, %v883_v59  ;;  %v577_v12 = vrot.slane %v563_v18, %v1733_v37  ;;  %v1371_v39 = vadd.f32 %v1369_v9, %v1361_v50 }
 0x15e   :  { %v1059_v38 = vrot.slane %v1058_v63, 6  ;;  %v1219_v57 = vrot.slane %v1218_v55, 6 }
 0x160   :  { %v1060_v0 = vsel %vm311_vm8, %v1059_v38, %v1058_v63  ;;  %v1220_v16 = vsel %vm300_vm7, %v1219_v57, %v1218_v55  ;;  %v407_v63 = vrot.slane %v393_v21, %v1733_v37 }
 0x161   :  { %v899_v42 = vpop.permute.xlu1 %898  ;;  %v2226_v4 = vpop.permute.xlu0 %1377  ;;  %v1062_v2 = vadd.f32 %v1060_v0, %v1052_v5  ;;  %v1222_v41 = vadd.f32 %v1220_v16, %v1212_v61 }
 0x162   :  { %v900_v23 = vrot.slane %v899_v42, 6  ;;  %v1379_v33 = vrot.slane %v2226_v4, 6 }
 0x164   :  { %v901_v1 = vsel %vm322_vm9, %v900_v23, %v899_v42  ;;  %v1380_v28 = vsel %vm288_vm6, %v1379_v33, %v2226_v4  ;;  %vm1266_vm6 = vcmask 375808  }
 0x165   :  { %v2234_v3 = vadd.f32 %v901_v1, %v893_v14  ;;  %v1228_v54 = vpop.permute.xlu1 %1227  ;;  %v1068_v6 = vpop.permute.xlu0 %1067  ;;  %v1382_v42 = vadd.f32 %v1380_v28, %v1371_v39 }
 0x166   :  { %v1229_v51 = vrot.slane %v1228_v54, 6  ;;  %v1069_v10 = vrot.slane %v1068_v6, 6 }
 0x167   :  { %v912_v49 = vrot.slane %v2234_v3, %v1733_v37  ;;  %v905_v59 = vcombine.high %v2234_v3, %v2234_v3 }
 0x168   :  { %v1230_v27 = vsel %vm311_vm8, %v1229_v51, %v1228_v54  ;;  %v1070_v13 = vsel %vm322_vm9, %v1069_v10, %v1068_v6 }
 0x169   :  { %v1072_v60 = vadd.f32 %v1070_v13, %v1062_v2  ;;  %v1238_v20 = vpop.permute.xlu1 %1237  ;;  %921 = vrot.lane.b32.xlu1 %v912_v49, %s1689_s23  ;;  %v1232_v17 = vadd.f32 %v1230_v27, %v1222_v41  ;;  %v1388_v15 = vpop.permute.xlu0 %1387  ;;  %v920_v53 = vcombine.high %v912_v49, %v912_v49  ;;  %v919_v14 = vrot.slane %v905_v59, %v1733_v37 }
 0x16a   :  { %v1239_v22 = vrot.slane %v1238_v20, 6  ;;  %v1389_v47 = vrot.slane %v1388_v15, 6  ;;  %v220_v27 = vand.u32 127, %v162_v24 }
 0x16b   :  { %v1081_v58 = vrot.slane %v1072_v60, %v1733_v37  ;;  %v1074_v32 = vcombine.high %v1072_v60, %v1072_v60 }
 0x16c   :  { %v1240_v44 = vsel %vm322_vm9, %v1239_v22, %v1238_v20  ;;  %v1390_v19 = vsel %vm300_vm7, %v1389_v47, %v1388_v15  ;;  %v221_v60 = vadd.s32 128, %v220_v27  ;;  %v2296_v20 = vand.u32 15, %v220_v27 }
 0x16d   :  { %v1242_v52 = vadd.f32 %v1240_v44, %v1232_v17  ;;  %1090 = vrot.lane.b32.xlu0 %v1081_v58, %s1693_s6  ;;  %v1398_v26 = vpop.permute.xlu0 %1397  ;;  %v1408_v36 = vpop.permute.xlu1 %1407  ;;  %v1392_v23 = vadd.f32 %v1390_v19, %v1382_v42  ;;  %v1088_v45 = vrot.slane %v1074_v32, %v1733_v37  ;;  %v1089_v0 = vcombine.high %v1081_v58, %v1081_v58 }
 0x16e   :  { %v1399_v38 = vrot.slane %v1398_v26, 6  ;;  %v1409_v57 = vrot.slane %v1408_v36, 6  ;;  %v2298_v17 = vand.u32 15, %v221_v60  ;;  %vm248_vm11 = vcmp.ge.s32.totalorder %v2296_v20, 3 }
 0x16f   :  { %v1251_v55 = vrot.slane %v1242_v52, %v1733_v37  ;;  %v1244_v48 = vcombine.high %v1242_v52, %v1242_v52  ;;  %v247_v52 = vstv %s2331_s2  ;;  %vm424_vm15 = vcmp.ge.s32.totalorder %v2296_v20, 2  ;;  %s1696_s2 = smov [#allocation11]  }
 0x170   :  { %v1400_v4 = vsel %vm311_vm8, %v1399_v38, %v1398_v26  ;;  %v1410_v46 = vsel %vm322_vm9, %v1409_v57, %v1408_v36  ;;  %vm249_vm14 = vcmp.ge.s32.totalorder %v2298_v17, 3  ;;  %vm425_vm0 = vcmp.ge.s32.totalorder %v2298_v17, 2  ;;  %s1475_s12 = sshll.u32 %s1696_s2, 4  ;;  %s1476_s12 = int_to_ptr.vmem [resolvable:$true] %s1475_s12 }
 0x171   :  { %1260 = vrot.lane.b32.xlu1 %v1251_v55, %s1694_s7  ;;  %413 = vrot.lane.b32.xlu0 %v407_v63, %s1690_s20  ;;  %v1402_v62 = vadd.f32 %v1400_v4, %v1392_v23  ;;  %v1259_v31 = vcombine.high %v1251_v55, %v1251_v55  ;;  %v1258_v5 = vrot.slane %v1244_v48, %v1733_v37  ;;  %vm594_vm1 = vcmp.ge.s32.totalorder %v2296_v20, 1  ;;  %s1649_s13 = scalar_lea.vmem %s1476_s12, 64  ;;  %p1654_p0 = scmp.lt.s32.totalorder %s1476_s12, %s1476_s12 }
 0x172   :  { %vm595_vm2 = vcmp.ge.s32.totalorder %v2298_v17, 1  ;;  %vm937_vm4 = vcmp.lt.s32.totalorder %v2296_v20, 15  ;;  %vm938_vm5 = vcmp.lt.s32.totalorder %v2298_v17, 15  ;;  %vm1108_vm7 = vcmp.lt.s32.totalorder %v2298_v17, 14  ;;  %p1650_p13 = scmp.ne.s32.totalorder %s1476_s12, %s1649_s13  ;;  %p1655_p1 = scmp.lt.s32.totalorder %s1649_s13, %s1649_s13 }
 0x173   :  { %v1412_v1 = vadd.f32 %v1410_v46, %v1402_v62  ;;  %vm1107_vm9 = vcmp.lt.s32.totalorder %v2296_v20, 14 }
 0x174   :  { %p1656_p2 = por %p1655_p1, %p1654_p0 }
 0x175   :  { %411 = vrot.lane.b32.xlu1 %v408_v8, %s1690_s20  ;;  %581 = vrot.lane.b32.xlu0 %v578_v56, %s1691_s29  ;;  %v1414_v3 = vcombine.high %v1412_v1, %v1412_v1  ;;  %v1421_v54 = vrot.slane %v1412_v1, %v1733_v37 }
 0x176   :  { %p1657_p3 = pnand %p1656_p2, %p1650_p13 }
 0x177   :  { %v1428_v6 = vrot.slane %v1414_v3, %v1733_v37  ;;  %v1429_v16 = vcombine.high %v1421_v54, %v1421_v54 }
 0x179   :  { %583 = vrot.lane.b32.xlu1 %v577_v12, %s1691_s29  ;;  %753 = vrot.lane.b32.xlu0 %v747_v25, %s1692_s4 }
 0x17d   :  { %751 = vrot.lane.b32.xlu1 %v748_v11, %s1692_s4  ;;  %923 = vrot.lane.b32.xlu0 %v920_v53, %s1689_s23 }
 0x181   :  { %925 = vrot.lane.b32.xlu1 %v919_v14, %s1689_s23  ;;  %1094 = vrot.lane.b32.xlu0 %v1088_v45, %s1693_s6 }
 0x185   :  { %1092 = vrot.lane.b32.xlu1 %v1089_v0, %s1693_s6  ;;  %1262 = vrot.lane.b32.xlu0 %v1259_v31, %s1694_s7 }
 0x189   :  { %1264 = vrot.lane.b32.xlu1 %v1258_v5, %s1694_s7  ;;  %1430 = vrot.lane.b32.xlu0 %v1421_v54, %s1695_s8 }
 0x18d   :  { %1432 = vrot.lane.b32.xlu1 %v1429_v16, %s1695_s8  ;;  %1434 = vrot.lane.b32.xlu0 %v1428_v6, %s1695_s8 }
 0x1b3   :  { %v410_v51 = vpop.permute.xlu0 %409 }
 0x1bf   :  { %v580_v10 = vpop.permute.xlu1 %579 }
 0x1cb   :  { %v750_v61 = vpop.permute.xlu0 %749 }
 0x1db   :  { %v922_v2 = vpop.permute.xlu1 %921 }
 0x1df   :  { %v1091_v49 = vpop.permute.xlu0 %1090 }
 0x1e3   :  { %v1261_v13 = vpop.permute.xlu1 %1260  ;;  %v414_v41 = vpop.permute.xlu0 %413 }
 0x1e7   :  { %v412_v22 = vpop.permute.xlu1 %411  ;;  %v582_v21 = vpop.permute.xlu0 %581 }
 0x1e8   :  { %v416_v37 = vsel %vm415_vm10, %v410_v51, %v412_v22  ;;  %v417_v30 = vsel %vm415_vm10, %v412_v22, %v414_v41  ;;  %v586_v34 = vsel %vm585_vm12, %v580_v10, %v582_v21  ;;  %vm1436_vm10 = vcmask 367616  }
 0x1e9   :  { %v420_v24 = vsel %vm248_vm11, %v416_v37, 0.0  ;;  %v421_v18 = vsel %vm249_vm14, %v417_v30, 0.0  ;;  %v590_v8 = vsel %vm424_vm15, %v586_v34, 0.0  ;;  %vm1277_vm11 = vcmp.lt.s32.totalorder %v2296_v20, 13 }
 0x1ea   :  { %v422_v63 = vadd.f32 %v420_v24, %v247_v52  ;;  %v423_v26 = vadd.f32 %v421_v18, %v247_v52 }
 0x1eb   :  { %v584_v58 = vpop.permute.xlu1 %583  ;;  %v754_v44 = vpop.permute.xlu0 %753 }
 0x1ec   :  { %v587_v29 = vsel %vm585_vm12, %v582_v21, %v584_v58  ;;  %v592_v9 = vadd.f32 %v590_v8, %v422_v63 }
 0x1ed   :  { %v591_v56 = vsel %vm425_vm0, %v587_v29, 0.0 }
 0x1ee   :  { %v593_v50 = vadd.f32 %v591_v56, %v423_v26 }
 0x1ef   :  { %v752_v15 = vpop.permute.xlu1 %751  ;;  %v924_v55 = vpop.permute.xlu0 %923 }
 0x1f0   :  { %v756_v40 = vsel %vm755_vm13, %v750_v61, %v752_v15  ;;  %v757_v7 = vsel %vm755_vm13, %v752_v15, %v754_v44  ;;  %v927_v19 = vsel %vm311_vm8, %v922_v2, %v924_v55 }
 0x1f1   :  { %v760_v43 = vsel %vm594_vm1, %v756_v40, 0.0  ;;  %v761_v47 = vsel %vm595_vm2, %v757_v7, 0.0 }
 0x1f2   :  { %v762_v12 = vadd.f32 %v760_v43, %v592_v9  ;;  %v763_v38 = vadd.f32 %v761_v47, %v593_v50 }
 0x1f3   :  { %v926_v33 = vpop.permute.xlu1 %925  ;;  %v1095_v35 = vpop.permute.xlu0 %1094 }
 0x1f4   :  { %v928_v11 = vsel %vm311_vm8, %v924_v55, %v926_v33  ;;  %v933_v42 = vadd.f32 %v927_v19, %v762_v12  ;;  %vm1278_vm8 = vcmp.lt.s32.totalorder %v2298_v17, 13 }
 0x1f5   :  { %v934_v57 = vadd.f32 %v928_v11, %v763_v38 }
 0x1f7   :  { %v1093_v25 = vpop.permute.xlu1 %1092  ;;  %v1263_v28 = vpop.permute.xlu0 %1262 }
 0x1f8   :  { %v1097_v39 = vsel %vm1096_vm3, %v1091_v49, %v1093_v25  ;;  %v1098_v36 = vsel %vm1096_vm3, %v1093_v25, %v1095_v35  ;;  %v1267_v45 = vsel %vm1266_vm6, %v1261_v13, %v1263_v28 }
 0x1f9   :  { %v1101_v59 = vsel %vm937_vm4, %v1097_v39, 0.0  ;;  %v1102_v32 = vsel %vm938_vm5, %v1098_v36, 0.0  ;;  %v1271_v48 = vsel %vm1107_vm9, %v1267_v45, 0.0 }
 0x1fa   :  { %v1103_v23 = vadd.f32 %v1101_v59, %v933_v42  ;;  %v1104_v46 = vadd.f32 %v1102_v32, %v934_v57 }
 0x1fb   :  { %v1265_v53 = vpop.permute.xlu1 %1264  ;;  %v1431_v4 = vpop.permute.xlu0 %1430 }
 0x1fc   :  { %v1268_v62 = vsel %vm1266_vm6, %v1263_v28, %v1265_v53  ;;  %v1273_v31 = vadd.f32 %v1271_v48, %v1103_v23 }
 0x1fd   :  { %v1272_v14 = vsel %vm1108_vm7, %v1268_v62, 0.0 }
 0x1fe   :  { %v1274_v5 = vadd.f32 %v1272_v14, %v1104_v46 }
 0x1ff   :  { %v1433_v0 = vpop.permute.xlu1 %1432  ;;  %v1435_v1 = vpop.permute.xlu0 %1434 }
 0x200   :  { %v1437_v3 = vsel %vm1436_vm10, %v1431_v4, %v1433_v0  ;;  %v1438_v54 = vsel %vm1436_vm10, %v1433_v0, %v1435_v1 }
 0x201   :  { %v1441_v6 = vsel %vm1277_vm11, %v1437_v3, 0.0  ;;  %v1442_v16 = vsel %vm1278_vm8, %v1438_v54, 0.0 }
 0x202   :  { %v1443_v51 = vadd.f32 %v1441_v6, %v1273_v31  ;;  %v1444_v10 = vadd.f32 %v1442_v16, %v1274_v5 }
 0x204   :  { %v1582_v61 = vmul.f32 -1.442695, %v1443_v51  ;;  %v1583_v2 = vmul.f32 -1.442695, %v1444_v10 }
 0x206   :  { %1607 = vpow2.f32 %v1582_v61 }
 0x207   :  { %1609 = vpow2.f32 %v1583_v2 }
 0x210   :  { %v1608_v49 = vpop.eup %1607 }
 0x211   :  { %v1610_v27 = vpop.eup %1609  ;;  %v1451_v13 = vadd.f32 1.0, %v1608_v49 }
 0x212   :  { %v1452_v41 = vadd.f32 1.0, %v1610_v27 }
 0x213   :  { %1611 = vrcp.f32 %v1451_v13 }
 0x214   :  { %1613 = vrcp.f32 %v1452_v41 }
 0x21d   :  { %v1612_v60 = vpop.eup %1611 }
 0x21e   :  { %v1614_v20 = vpop.eup %1613 }
 0x21f   :  { %v1459_v22 = vcombine.low %v1612_v60, %v1614_v20 }
 0x221   :  { %1584 = vst.sshfl [vmem:[#allocation11] sm:$0x33 pattern:$0x76325410] %v1459_v22 }
 0x222   :  { %1660 = shalt.err (!%p1657_p3)
}
 0x223   :  { %s1661_s11 = scalar_lea.hbm %s2332_s3, 64 }
 0x224   :  { %p1662_p4 = scmp.ne.s32.totalorder %s2332_s3, %s1661_s11  ;;  %p1665_p5 = scmp.lt.u32.totalorder %s1661_s11, %s2332_s3 }
 0x226   :  { %p1667_p6 = pnand %p1665_p5, %p1662_p4 }
 0x228   :  { %1670 = shalt.err (!%p1667_p6)
}
 0x229   :  { %1478 = dma.vmem_to_hbm [thread:$0]  %s1476_s12, 64, %s2332_s3, [#allocation8]  }
 0x22a   :  { %1675 = dma.done.wait [#allocation8], 64  }
 0x22b   :  { %1676 = vsyncadd [#allocation8], 4294967232 }
 0x22c   :  { %1482 = vsyncpa [#allocation7], 1 }
 0x22d   :  { %1483 = vsyncpa [#allocation8], 1 }
 0x22e   :  { %1484 = vsyncpa [#allocation9], 1 }

</bundles_post_ra>
